<compile_context>
chip_gen: v6e
topology: v6e:2x2x1
jax: 0.10.0
libtpu: 0.0.40
codegen_flags: <defaults>
</compile_context>

<pallas_src>
import functools
import itertools
import math

import numpy as np
import jax
import jax.numpy as jnp
from jax.experimental import pallas as pl
from jax.experimental.pallas import tpu as pltpu

LOG2 = math.log(2.0)


def _ssp(t):
    # shifted softplus, numerically stable: softplus(t) - log(2)
    return jnp.maximum(t, 0.0) + jnp.log1p(jnp.exp(-jnp.abs(t))) - LOG2


def schnet_kernel(e_ref, x_ref, y_ref, mask_ref,
                  w1_ref, w2_ref, wh_ref, wg_ref, b_ref,
                  out_ref, *, bt, n_elec, n_nuc, kdim, emb):
    """One grid step processes `bt` batch elements, fully fused."""
    n_pair = n_elec * n_elec
    n_all = n_elec * (n_elec + n_nuc)

    # --- packed biases (rows 0..3 of an (8, max(kdim, emb)) f32 slab) ---
    b1 = b_ref[0:1, :kdim]
    b2 = b_ref[1:2, :kdim]
    bh = b_ref[2:3, :kdim]
    bg = b_ref[3:4, :emb]

    # --- fused w subnet over concatenated e-e + e-n edge rows ------------
    # e_ref block is already 2-D: (bt * n_elec * (n_elec + n_nuc), dist)
    e = e_ref[...]
    t = jnp.dot(e, w1_ref[...], preferred_element_type=jnp.float32) + b1
    t = _ssp(t).astype(e.dtype)        # SSP in f32, cast back for bf16 MXU
    w_all = jnp.dot(t, w2_ref[...], preferred_element_type=jnp.float32) + b2
    w_all = w_all.reshape(bt, n_all, kdim)
    we = w_all[:, :n_pair, :].reshape(bt, n_elec, n_elec, kdim)   # (b,i,j,k)
    wn = w_all[:, n_pair:, :].reshape(bt, n_elec, n_nuc, kdim)    # (b,i,N,k)

    # --- h subnet: single linear layer -----------------------------------
    h = jnp.dot(x_ref[...], wh_ref[...],
                preferred_element_type=jnp.float32) + bh          # (bt*n_e, k)
    h = h.reshape(bt, n_elec, kdim)

    # --- messages ---------------------------------------------------------
    mask = mask_ref[...]                                          # (n_e,n_e,1)
    z_elec = jnp.sum(we * h[:, None, :, :] * mask[None], axis=2)  # (bt,n_e,k)
    y = y_ref[...].astype(jnp.float32)                            # (bt,n_N,k)
    z_nuc = jnp.sum(wn * y[:, None, :, :], axis=2)                # (bt,n_e,k)
    z = (z_elec + z_nuc).reshape(bt * n_elec, kdim)

    # --- g subnet ----------------------------------------------------------
    out = jnp.dot(z.astype(wg_ref.dtype), wg_ref[...],
                  preferred_element_type=jnp.float32) + bg
    out_ref[...] = out.astype(out_ref.dtype)


def _pick_batch_block(B, n_elec, n_nuc, dist, kdim, emb, itemsize):
    """Largest divisor of B whose resident VMEM footprint fits a safe budget."""
    rows = n_elec * (n_elec + n_nuc)
    lane = lambda d: max(d, 128)                   # VMEM lane padding
    per_b = (rows * lane(dist) * itemsize * 2      # double-buffered edge block
             + rows * lane(kdim) * 4 * 3           # f32 w-subnet intermediates
             + n_elec * (lane(emb) + lane(kdim)) * 4)
    budget = 8 * 1024 * 1024                       # conservative (v7x = 64 MiB)
    bt = int(max(1, min(B, budget // max(per_b, 1))))
    while B % bt:
        bt -= 1
    return bt


def schnet_layer(x, Y, edges_elec, edges_nuc, params, *,
                 dtype=jnp.float32, batch_block=None):
    B, n_elec, emb = x.shape
    _, n_nuc, kdim = Y.shape
    dist = edges_elec.shape[-1]
    w1, b1, w2, b2, wh, bh, wg, bg = params
    rows = n_elec * (n_elec + n_nuc)

    # ---- wrapper-side layout: flat, lane/sublane friendly -----------------
    edges_all = jnp.concatenate(
        [edges_elec.reshape(B, n_elec * n_elec, dist),
         edges_nuc.reshape(B, n_elec * n_nuc, dist)], axis=1,
    ).reshape(B * rows, dist).astype(dtype)
    x_flat = x.reshape(B * n_elec, emb).astype(dtype)
    y_in = Y.astype(dtype)

    # packed biases (f32, single (8, max) slab)
    bmax = max(kdim, emb)
    b_pack = jnp.zeros((8, bmax), jnp.float32)
    b_pack = b_pack.at[0, :kdim].set(b1.reshape(-1))
    b_pack = b_pack.at[1, :kdim].set(b2.reshape(-1))
    b_pack = b_pack.at[2, :kdim].set(bh.reshape(-1))
    b_pack = b_pack.at[3, :emb].set(bg.reshape(-1))

    # precomputed off-diagonal mask (replaces in-kernel iota/compare/cast)
    mask = (1.0 - jnp.eye(n_elec, dtype=jnp.float32)).reshape(n_elec, n_elec, 1)

    w1c, w2c, whc, wgc = (w.astype(dtype) for w in (w1, w2, wh, wg))

    itemsize = jnp.dtype(dtype).itemsize
    bt = batch_block or _pick_batch_block(B, n_elec, n_nuc, dist, kdim, emb,
                                          itemsize)
    assert B % bt == 0, "batch block must divide batch size"
    grid = (B // bt,)

    kernel = functools.partial(schnet_kernel, bt=bt, n_elec=n_elec,
                               n_nuc=n_nuc, kdim=kdim, emb=emb)

    def const_spec(shape):
        return pl.BlockSpec(shape, lambda b, _n=len(shape): (0,) * _n)

    out_flat = pl.pallas_call(
        kernel,
        out_shape=jax.ShapeDtypeStruct((B * n_elec, emb), jnp.float32),
        grid_spec=pltpu.PrefetchScalarGridSpec(
            num_scalar_prefetch=0,
            grid=grid,
            in_specs=[
                pl.BlockSpec((bt * rows, dist), lambda b: (b, 0)),
                pl.BlockSpec((bt * n_elec, emb), lambda b: (b, 0)),
                pl.BlockSpec((bt, n_nuc, kdim), lambda b: (b, 0, 0)),
                const_spec(mask.shape),
                const_spec(w1c.shape), const_spec(w2c.shape),
                const_spec(whc.shape), const_spec(wgc.shape),
                const_spec(b_pack.shape),
            ],
            out_specs=pl.BlockSpec((bt * n_elec, emb), lambda b: (b, 0)),
        ),
        compiler_params=pltpu.CompilerParams(
            dimension_semantics=("parallel",),
            vmem_limit_bytes=32 * 1024 * 1024,
        ),
    )(edges_all, x_flat, y_in, mask, w1c, w2c, whc, wgc, b_pack)
    return out_flat.reshape(B, n_elec, emb)


def reference(x, Y, ee, en, params):
    """Pure-JAX replica of the PyTorch forward (incl. idx_perm gather)."""
    w1, b1, w2, b2, wh, bh, wg, bg = params

    def w_net(e):
        t = e @ w1 + b1[0]
        t = _ssp(t)
        return t @ w2 + b2[0]

    h = x @ wh + bh[0]
    n_elec = x.shape[1]
    perms = np.array(list(itertools.permutations(range(n_elec), 2))).T
    i_idx = perms[0].reshape(n_elec, n_elec - 1)
    j_idx = perms[1].reshape(n_elec, n_elec - 1)
    e_gath = ee[:, i_idx, j_idx, :]                        # (B, n_e, n_e-1, d)
    z_elec = (w_net(e_gath) * h[:, j_idx, :]).sum(-2)
    z_nuc = (w_net(en) * Y[:, None, :, :]).sum(-2)
    return (z_elec + z_nuc) @ wg + bg[0]


if __name__ == "__main__":
    B, n_elec, n_nuc = 2, 8, 4
    dist_feat, emb, kdim = 16, 32, 32

    key = jax.random.PRNGKey(0)
    ks = jax.random.split(key, 8)
    x = jax.random.normal(ks[0], (B, n_elec, emb), jnp.float32)
    Y = jax.random.normal(ks[1], (B, n_nuc, kdim), jnp.float32)
    edges_elec = jax.random.normal(ks[2], (B, n_elec, n_elec, dist_feat),
                                   jnp.float32)
    edges_nuc = jax.random.normal(ks[3], (B, n_elec, n_nuc, dist_feat),
                                  jnp.float32)

    def lin_init(k, fan_in, fan_out):
        kw, kb = jax.random.split(k)
        bound = 1.0 / math.sqrt(fan_in)
        W = jax.random.uniform(kw, (fan_in, fan_out), jnp.float32, -bound, bound)
        b = jax.random.uniform(kb, (1, fan_out), jnp.float32, -bound, bound)
        return W, b

    w1, b1 = lin_init(ks[4], dist_feat, kdim)   # w subnet layer 1
    w2, b2 = lin_init(ks[5], kdim, kdim)        # w subnet layer 2
    wh, bh = lin_init(ks[6], emb, kdim)         # h subnet
    wg, bg = lin_init(ks[7], kdim, emb)         # g subnet
    params = (w1, b1, w2, b2, wh, bh, wg, bg)

    ref = jax.block_until_ready(reference(x, Y, edges_elec, edges_nuc, params))

    # f32 path (default): exact semantics, tight tolerance.
    out = jax.block_until_ready(
        schnet_layer(x, Y, edges_elec, edges_nuc, params, dtype=jnp.float32))
    np.testing.assert_allclose(np.asarray(out), np.asarray(ref),
                               rtol=2e-5, atol=2e-5)

    # bf16 data/weight path (v6e/v7x bandwidth + MXU throughput); compare
    # against the reference evaluated on bf16-rounded inputs/weights.
    def _q(a):
        return a.astype(jnp.bfloat16).astype(jnp.float32)

    params_q = tuple(_q(p) if i % 2 == 0 else p for i, p in enumerate(params))
    ref_bf = jax.block_until_ready(
        reference(_q(x), _q(Y), _q(edges_elec), _q(edges_nuc), params_q))
    out_bf = jax.block_until_ready(
        schnet_layer(x, Y, edges_elec, edges_nuc, params, dtype=jnp.bfloat16))
    np.testing.assert_allclose(np.asarray(out_bf), np.asarray(ref_bf),
                               rtol=2e-2, atol=2e-2)

    print("KERNEL_OK")
</pallas_src>

<mosaic_0001>
module attributes {stable_mosaic.version = 11 : i64} {
  func.func @schnet_kernel(%arg0: i32, %arg1: memref<192x16xf32, #tpu.memory_space<vmem>>, %arg2: memref<16x32xf32, #tpu.memory_space<vmem>>, %arg3: memref<2x4x32xf32, #tpu.memory_space<vmem>>, %arg4: memref<8x8x1xf32, #tpu.memory_space<vmem>>, %arg5: memref<16x32xf32, #tpu.memory_space<vmem>>, %arg6: memref<32x32xf32, #tpu.memory_space<vmem>>, %arg7: memref<32x32xf32, #tpu.memory_space<vmem>>, %arg8: memref<32x32xf32, #tpu.memory_space<vmem>>, %arg9: memref<8x32xf32, #tpu.memory_space<vmem>>, %arg10: memref<16x32xf32, #tpu.memory_space<vmem>>) attributes {dimension_semantics = [#tpu.dimension_semantics<parallel>], iteration_bounds = array<i64: 1>, scalar_prefetch = 0 : i64, scratch_operands = 0 : i64, tpu.core_type = #tpu.core_type<tc>, window_params = [{transform_indices = @transform_0, window_bounds = array<i64: 192, 16>}, {transform_indices = @transform_1, window_bounds = array<i64: 16, 32>}, {transform_indices = @transform_2, window_bounds = array<i64: 2, 4, 32>}, {pipeline_mode = #tpu.pipeline_mode<synchronous>, transform_indices = @transform_3, window_bounds = array<i64: 8, 8, 1>}, {pipeline_mode = #tpu.pipeline_mode<synchronous>, transform_indices = @transform_4, window_bounds = array<i64: 16, 32>}, {pipeline_mode = #tpu.pipeline_mode<synchronous>, transform_indices = @transform_5, window_bounds = array<i64: 32, 32>}, {pipeline_mode = #tpu.pipeline_mode<synchronous>, transform_indices = @transform_6, window_bounds = array<i64: 32, 32>}, {pipeline_mode = #tpu.pipeline_mode<synchronous>, transform_indices = @transform_7, window_bounds = array<i64: 32, 32>}, {pipeline_mode = #tpu.pipeline_mode<synchronous>, transform_indices = @transform_8, window_bounds = array<i64: 8, 32>}, {transform_indices = @transform_9, window_bounds = array<i64: 16, 32>}]} {
    %c0 = arith.constant 0 : index
    %c0_0 = arith.constant 0 : index
    %0 = vector.load %arg9[%c0, %c0_0] : memref<8x32xf32, #tpu.memory_space<vmem>>, vector<1x32xf32>
    %c1 = arith.constant 1 : index
    %c0_1 = arith.constant 0 : index
    %1 = vector.load %arg9[%c1, %c0_1] : memref<8x32xf32, #tpu.memory_space<vmem>>, vector<1x32xf32>
    %c2 = arith.constant 2 : index
    %c0_2 = arith.constant 0 : index
    %2 = vector.load %arg9[%c2, %c0_2] : memref<8x32xf32, #tpu.memory_space<vmem>>, vector<1x32xf32>
    %c3 = arith.constant 3 : index
    %c0_3 = arith.constant 0 : index
    %3 = vector.load %arg9[%c3, %c0_3] : memref<8x32xf32, #tpu.memory_space<vmem>>, vector<1x32xf32>
    %c0_4 = arith.constant 0 : index
    %c0_5 = arith.constant 0 : index
    %4 = vector.load %arg1[%c0_4, %c0_5] : memref<192x16xf32, #tpu.memory_space<vmem>>, vector<192x16xf32>
    %c0_6 = arith.constant 0 : index
    %c0_7 = arith.constant 0 : index
    %5 = vector.load %arg5[%c0_6, %c0_7] : memref<16x32xf32, #tpu.memory_space<vmem>>, vector<16x32xf32>
    %cst = arith.constant dense<0.000000e+00> : vector<192x32xf32>
    %6 = tpu.matmul %4, %5, %cst {dimension_numbers = #tpu.dot_dimension_numbers<[1], [0], [0], [1], [0, 0, 1, 1], [], []>} : vector<192x16xf32>, vector<16x32xf32>, vector<192x32xf32> -> vector<192x32xf32>
    %7 = vector.broadcast %0 : vector<1x32xf32> to vector<192x32xf32>
    %8 = arith.addf %6, %7 : vector<192x32xf32>
    %cst_8 = arith.constant 0.000000e+00 : f32
    %9 = vector.broadcast %cst_8 : f32 to vector<192x32xf32>
    %10 = arith.maximumf %8, %9 : vector<192x32xf32>
    %11 = math.absf %8 : vector<192x32xf32>
    %cst_9 = arith.constant 0.000000e+00 : f32
    %12 = vector.broadcast %cst_9 : f32 to vector<192x32xf32>
    %13 = arith.subf %12, %11 : vector<192x32xf32>
    %14 = math.exp %13 : vector<192x32xf32>
    %15 = math.log1p %14 : vector<192x32xf32>
    %16 = arith.addf %10, %15 : vector<192x32xf32>
    %cst_10 = arith.constant 0.693147182 : f32
    %17 = vector.broadcast %cst_10 : f32 to vector<192x32xf32>
    %18 = arith.subf %16, %17 : vector<192x32xf32>
    %c0_11 = arith.constant 0 : index
    %c0_12 = arith.constant 0 : index
    %19 = vector.load %arg6[%c0_11, %c0_12] : memref<32x32xf32, #tpu.memory_space<vmem>>, vector<32x32xf32>
    %cst_13 = arith.constant dense<0.000000e+00> : vector<192x32xf32>
    %20 = tpu.matmul %18, %19, %cst_13 {dimension_numbers = #tpu.dot_dimension_numbers<[1], [0], [0], [1], [0, 0, 1, 1], [], []>} : vector<192x32xf32>, vector<32x32xf32>, vector<192x32xf32> -> vector<192x32xf32>
    %21 = vector.broadcast %1 : vector<1x32xf32> to vector<192x32xf32>
    %22 = arith.addf %20, %21 : vector<192x32xf32>
    %23 = vector.shape_cast %22 : vector<192x32xf32> to vector<2x96x32xf32>
    %24 = vector.extract_strided_slice %23 {offsets = [0, 0, 0], sizes = [2, 64, 32], strides = [1, 1, 1]} : vector<2x96x32xf32> to vector<2x64x32xf32>
    %25 = vector.shape_cast %24 : vector<2x64x32xf32> to vector<2x8x8x32xf32>
    %26 = vector.extract_strided_slice %23 {offsets = [0, 64, 0], sizes = [2, 32, 32], strides = [1, 1, 1]} : vector<2x96x32xf32> to vector<2x32x32xf32>
    %27 = vector.shape_cast %26 : vector<2x32x32xf32> to vector<2x8x4x32xf32>
    %c0_14 = arith.constant 0 : index
    %c0_15 = arith.constant 0 : index
    %28 = vector.load %arg2[%c0_14, %c0_15] : memref<16x32xf32, #tpu.memory_space<vmem>>, vector<16x32xf32>
    %c0_16 = arith.constant 0 : index
    %c0_17 = arith.constant 0 : index
    %29 = vector.load %arg7[%c0_16, %c0_17] : memref<32x32xf32, #tpu.memory_space<vmem>>, vector<32x32xf32>
    %cst_18 = arith.constant dense<0.000000e+00> : vector<16x32xf32>
    %30 = tpu.matmul %28, %29, %cst_18 {dimension_numbers = #tpu.dot_dimension_numbers<[1], [0], [0], [1], [0, 0, 1, 1], [], []>} : vector<16x32xf32>, vector<32x32xf32>, vector<16x32xf32> -> vector<16x32xf32>
    %31 = vector.broadcast %2 : vector<1x32xf32> to vector<16x32xf32>
    %32 = arith.addf %30, %31 : vector<16x32xf32>
    %33 = vector.shape_cast %32 : vector<16x32xf32> to vector<2x8x32xf32>
    %c0_19 = arith.constant 0 : index
    %c0_20 = arith.constant 0 : index
    %c0_21 = arith.constant 0 : index
    %34 = vector.load %arg4[%c0_19, %c0_20, %c0_21] : memref<8x8x1xf32, #tpu.memory_space<vmem>>, vector<8x8x1xf32>
    %35 = vector.shape_cast %33 : vector<2x8x32xf32> to vector<2x1x8x32xf32>
    %36 = vector.broadcast %35 : vector<2x1x8x32xf32> to vector<2x8x8x32xf32>
    %37 = arith.mulf %25, %36 : vector<2x8x8x32xf32>
    %38 = vector.shape_cast %34 : vector<8x8x1xf32> to vector<1x8x8x1xf32>
    %39 = vector.broadcast %38 : vector<1x8x8x1xf32> to vector<2x8x8x32xf32>
    %40 = arith.mulf %37, %39 : vector<2x8x8x32xf32>
    %cst_22 = arith.constant dense<0.000000e+00> : vector<2x8x32xf32>
    %41 = vector.multi_reduction <add>, %40, %cst_22 [2] : vector<2x8x8x32xf32> to vector<2x8x32xf32>
    %c0_23 = arith.constant 0 : index
    %c0_24 = arith.constant 0 : index
    %c0_25 = arith.constant 0 : index
    %42 = vector.load %arg3[%c0_23, %c0_24, %c0_25] : memref<2x4x32xf32, #tpu.memory_space<vmem>>, vector<2x4x32xf32>
    %43 = vector.shape_cast %42 : vector<2x4x32xf32> to vector<2x1x4x32xf32>
    %44 = vector.broadcast %43 : vector<2x1x4x32xf32> to vector<2x8x4x32xf32>
    %45 = arith.mulf %27, %44 : vector<2x8x4x32xf32>
    %cst_26 = arith.constant dense<0.000000e+00> : vector<2x8x32xf32>
    %46 = vector.multi_reduction <add>, %45, %cst_26 [2] : vector<2x8x4x32xf32> to vector<2x8x32xf32>
    %47 = arith.addf %41, %46 : vector<2x8x32xf32>
    %48 = vector.shape_cast %47 : vector<2x8x32xf32> to vector<16x32xf32>
    %c0_27 = arith.constant 0 : index
    %c0_28 = arith.constant 0 : index
    %49 = vector.load %arg8[%c0_27, %c0_28] : memref<32x32xf32, #tpu.memory_space<vmem>>, vector<32x32xf32>
    %cst_29 = arith.constant dense<0.000000e+00> : vector<16x32xf32>
    %50 = tpu.matmul %48, %49, %cst_29 {dimension_numbers = #tpu.dot_dimension_numbers<[1], [0], [0], [1], [0, 0, 1, 1], [], []>} : vector<16x32xf32>, vector<32x32xf32>, vector<16x32xf32> -> vector<16x32xf32>
    %51 = vector.broadcast %3 : vector<1x32xf32> to vector<16x32xf32>
    %52 = arith.addf %50, %51 : vector<16x32xf32>
    %c0_30 = arith.constant 0 : index
    %c0_31 = arith.constant 0 : index
    %53 = vector.load %arg10[%c0_30, %c0_31] : memref<16x32xf32, #tpu.memory_space<vmem>>, vector<16x32xf32>
    tpu.vector_store %arg10[%c0_30, %c0_31], %52 {strides = array<i32>} : memref<16x32xf32, #tpu.memory_space<vmem>>, vector<16x32xf32>,
    return
  }
  func.func @transform_0(%arg0: i32) -> (i32, i32) {
    %c0_i32 = arith.constant 0 : i32
    %c0_i32_0 = arith.constant 0 : i32
    return %arg0, %c0_i32 : i32, i32
  }
  func.func @transform_1(%arg0: i32) -> (i32, i32) {
    %c0_i32 = arith.constant 0 : i32
    %c0_i32_0 = arith.constant 0 : i32
    return %arg0, %c0_i32 : i32, i32
  }
  func.func @transform_2(%arg0: i32) -> (i32, i32, i32) {
    %c0_i32 = arith.constant 0 : i32
    %c0_i32_0 = arith.constant 0 : i32
    %c0_i32_1 = arith.constant 0 : i32
    return %arg0, %c0_i32, %c0_i32_0 : i32, i32, i32
  }
  func.func @transform_3(%arg0: i32) -> (i32, i32, i32) {
    %c0_i32 = arith.constant 0 : i32
    %c0_i32_0 = arith.constant 0 : i32
    %c0_i32_1 = arith.constant 0 : i32
    %c0_i32_2 = arith.constant 0 : i32
    return %c0_i32, %c0_i32_0, %c0_i32_1 : i32, i32, i32
  }
  func.func @transform_4(%arg0: i32) -> (i32, i32) {
    %c0_i32 = arith.constant 0 : i32
    %c0_i32_0 = arith.constant 0 : i32
    %c0_i32_1 = arith.constant 0 : i32
    return %c0_i32, %c0_i32_0 : i32, i32
  }
  func.func @transform_5(%arg0: i32) -> (i32, i32) {
    %c0_i32 = arith.constant 0 : i32
    %c0_i32_0 = arith.constant 0 : i32
    %c0_i32_1 = arith.constant 0 : i32
    return %c0_i32, %c0_i32_0 : i32, i32
  }
  func.func @transform_6(%arg0: i32) -> (i32, i32) {
    %c0_i32 = arith.constant 0 : i32
    %c0_i32_0 = arith.constant 0 : i32
    %c0_i32_1 = arith.constant 0 : i32
    return %c0_i32, %c0_i32_0 : i32, i32
  }
  func.func @transform_7(%arg0: i32) -> (i32, i32) {
    %c0_i32 = arith.constant 0 : i32
    %c0_i32_0 = arith.constant 0 : i32
    %c0_i32_1 = arith.constant 0 : i32
    return %c0_i32, %c0_i32_0 : i32, i32
  }
  func.func @transform_8(%arg0: i32) -> (i32, i32) {
    %c0_i32 = arith.constant 0 : i32
    %c0_i32_0 = arith.constant 0 : i32
    %c0_i32_1 = arith.constant 0 : i32
    return %c0_i32, %c0_i32_0 : i32, i32
  }
  func.func @transform_9(%arg0: i32) -> (i32, i32) {
    %c0_i32 = arith.constant 0 : i32
    %c0_i32_0 = arith.constant 0 : i32
    return %arg0, %c0_i32 : i32, i32
  }
}

</mosaic_0001>

<bundles_post_ra>
// kernel: tpu_custom_call.1
= control target key start
LH: loop header
LB: loop body
LE: loop exit
PB: predicated region body
PF: predicated region fallthrough
CT: control target
= control target key end

     0   :  { %vm67_vm0 = vcmask 130048   ;;  %s2958_s0 = inlined_call_operand.vmem [shape: f32[192,16], index: 0, kind: input, shape index: {}]   ;;  %s2959_s1 = inlined_call_operand.vmem [shape: f32[16,32], index: 1, kind: input, shape index: {}]   ;;  %s2960_s2 = inlined_call_operand.vmem [shape: f32[2,4,32], index: 2, kind: input, shape index: {}]   ;;  %s2961_s3 = inlined_call_operand.vmem [shape: f32[8,8,1], index: 3, kind: input, shape index: {}]   ;;  %s2962_s4 = inlined_call_operand.vmem [shape: f32[16,32], index: 4, kind: input, shape index: {}]   ;;  %s2963_s5 = inlined_call_operand.vmem [shape: f32[32,32], index: 5, kind: input, shape index: {}]   ;;  %s2964_s6 = inlined_call_operand.vmem [shape: f32[32,32], index: 6, kind: input, shape index: {}]   ;;  %s2965_s7 = inlined_call_operand.vmem [shape: f32[32,32], index: 7, kind: input, shape index: {}]   ;;  %s2966_s8 = inlined_call_operand.vmem [shape: f32[8,32], index: 8, kind: input, shape index: {}]   ;;  %s2967_s9 = inlined_call_operand.hbm [shape: f32[16,32], index: 9, kind: output, shape index: {}]  }
   0x1   :  { %v62_v0 = vld [vmem:[%s2962_s4 + $0x8] sm:$0xff]  ;;  %v61_v1 = vld [vmem:[%s2962_s4] sm:$0xff]  ;;  %v39_v4 = vld [vmem:[%s2958_s0 + $0x10] sm:$0xff] }
   0x2   :  { %v37_v2 = vld [vmem:[%s2958_s0] sm:$0xff]  ;;  %1717 = vmatprep.subr.mxu0 %v62_v0  ;;  %v38_v3 = vld [vmem:[%s2958_s0 + $0x8] sm:$0xff]  ;;  %v40_v5 = vld [vmem:[%s2958_s0 + $0x18] sm:$0xff] }
   0x3   :  { %1721 = vmatprep.mubr.msk.f32.mxu0 %vm67_vm0, %v37_v2  ;;  %1718 = vmatpush3.msra.mxu0 %v62_v0  ;;  %v41_v6 = vld [vmem:[%s2958_s0 + $0x20] sm:$0xff] }
   0x4   :  { %1719 = vmatprep.subr.mxu0 %v61_v1 }
   0x5   :  { %1720 = vmatpush3.msra.mxu0 %v61_v1 }
   0x6   :  { %1722 = vmatmul.mubr.msk.f32.vlgmr.msra.gmra.mxu0 %vm67_vm0, %v38_v3 }
   0x7   :  { %1724 = vmatprep.mubr.msk.f32.mxu0 %vm67_vm0, %v39_v4 }
   0x8   :  { %14 = vsyncpa [#allocation3], 0  ;;  %v42_v7 = vld [vmem:[%s2958_s0 + $0x28] sm:$0xff]  ;;  %v43_v8 = vld [vmem:[%s2958_s0 + $0x30] sm:$0xff]  ;;  %vm717_vm1 = vcmask 261120   ;;  %s1948_s18 = smov [#allocation2]  }
   0x9   :  { %v44_v9 = vld [vmem:[%s2958_s0 + $0x38] sm:$0xff]  ;;  %v45_v10 = vld [vmem:[%s2958_s0 + $0x40] sm:$0xff]  ;;  %v46_v11 = vld [vmem:[%s2958_s0 + $0x48] sm:$0xff]  ;;  %s1560_s4 = sshll.u32 %s1948_s18, 4  ;;  %s1561_s4 = int_to_ptr.vmem [resolvable:$true] %s1560_s4 }
   0xa   :  { %1725 = vmatmul.mubr.msk.f32.gmra.mxu0 %vm67_vm0, %v40_v5  ;;  %v47_v12 = vld [vmem:[%s2958_s0 + $0x50] sm:$0xff]  ;;  %v48_v13 = vld [vmem:[%s2958_s0 + $0x58] sm:$0xff]  ;;  %v49_v14 = vld [vmem:[%s2958_s0 + $0x60] sm:$0xff]  ;;  %s1925_s19 = scalar_lea.vmem %s1561_s4, 256  ;;  %p1930_p1 = scmp.lt.s32.totalorder %s1561_s4, %s1561_s4 }
   0xb   :  { %1727 = vmatprep.mubr.msk.f32.mxu0 %vm67_vm0, %v41_v6  ;;  %v50_v15 = vld [vmem:[%s2958_s0 + $0x68] sm:$0xff]  ;;  %v51_v16 = vld [vmem:[%s2958_s0 + $0x70] sm:$0xff]  ;;  %v52_v17 = vld [vmem:[%s2958_s0 + $0x78] sm:$0xff]  ;;  %p1926_p0 = scmp.ne.s32.totalorder %s1561_s4, %s1925_s19  ;;  %p1931_p2 = scmp.lt.s32.totalorder %s1925_s19, %s1925_s19 }
   0xc   :  { %v53_v18 = vld [vmem:[%s2958_s0 + $0x80] sm:$0xff]  ;;  %v54_v19 = vld [vmem:[%s2958_s0 + $0x88] sm:$0xff]  ;;  %v55_v20 = vld [vmem:[%s2958_s0 + $0x90] sm:$0xff] }
   0xd   :  { %v56_v21 = vld [vmem:[%s2958_s0 + $0x98] sm:$0xff]  ;;  %v57_v22 = vld [vmem:[%s2958_s0 + $0xa0] sm:$0xff]  ;;  %v58_v23 = vld [vmem:[%s2958_s0 + $0xa8] sm:$0xff]  ;;  %p1932_p3 = por %p1931_p2, %p1930_p1 }
   0xe   :  { %1728 = vmatmul.mubr.msk.f32.gmra.mxu0 %vm67_vm0, %v42_v7  ;;  %v59_v24 = vld [vmem:[%s2958_s0 + $0xb0] sm:$0xff]  ;;  %v60_v25 = vld [vmem:[%s2958_s0 + $0xb8] sm:$0xff]  ;;  %v1002_v30 = vld [vmem:[%s2964_s6 + $0x8] sm:$0xff] }
   0xf   :  { %1730 = vmatprep.mubr.msk.f32.mxu0 %vm67_vm0, %v43_v8  ;;  %v1004_v26 = vld [vmem:[%s2964_s6 + $0x18] sm:$0xff]  ;;  %v1003_v28 = vld [vmem:[%s2964_s6 + $0x10] sm:$0xff]  ;;  %v710_v31 = vld [vmem:[%s2963_s5 + $0x8] sm:$0xff]  ;;  %p1933_p4 = pnand %p1932_p3, %p1926_p0 }
  0x10   :  { %1801 = vmatprep.subr.mxu0 %v1004_v26  ;;  %v712_v27 = vld [vmem:[%s2963_s5 + $0x18] sm:$0xff]  ;;  %v711_v29 = vld [vmem:[%s2963_s5 + $0x10] sm:$0xff]  ;;  %v1001_v32 = vld [vmem:[%s2964_s6] sm:$0xff] }
  0x11   :  { %1802 = vmatpush3.msra.mxu0 %v1004_v26  ;;  %1757 = vmatprep.subr.mxu1 %v712_v27  ;;  %v999_v33 = vld [vmem:[%s2959_s1] sm:$0xff]  ;;  %v1000_v35 = vld [vmem:[%s2959_s1 + $0x8] sm:$0xff] }
  0x12   :  { %1731 = vmatmul.mubr.msk.f32.gmra.mxu0 %vm67_vm0, %v44_v9  ;;  %1803 = vmatprep.subr.mxu0 %v1003_v28  ;;  %v709_v34 = vld [vmem:[%s2963_s5] sm:$0xff] }
  0x13   :  { %1733 = vmatprep.mubr.msk.f32.mxu0 %vm67_vm0, %v45_v10  ;;  %1758 = vmatpush3.msra.mxu1 %v712_v27  ;;  %v2138_v44 = vld [vmem:[%s2966_s8] ss:$0 sm:$0xff] }
  0x14   :  { %1804 = vmatpush3.msra.mxu0 %v1003_v28  ;;  %1759 = vmatprep.subr.mxu1 %v711_v29 }
  0x15   :  { %1805 = vmatprep.subr.mxu0 %v1002_v30  ;;  %1760 = vmatpush3.msra.mxu1 %v711_v29 }
  0x16   :  { %1734 = vmatmul.mubr.msk.f32.gmra.mxu0 %vm67_vm0, %v46_v11  ;;  %1761 = vmatprep.subr.mxu1 %v710_v31 }
  0x17   :  { %1736 = vmatprep.mubr.msk.f32.mxu0 %vm67_vm0, %v47_v12  ;;  %1806 = vmatpush3.msra.mxu0 %v1002_v30 }
  0x18   :  { %1807 = vmatprep.subr.mxu0 %v1001_v32  ;;  %1762 = vmatpush3.msra.mxu1 %v710_v31 }
  0x19   :  { %1808 = vmatpush3.msra.mxu0 %v1001_v32  ;;  %1763 = vmatprep.subr.mxu1 %v709_v34 }
  0x1a   :  { %1737 = vmatmul.mubr.msk.f32.gmra.mxu0 %vm67_vm0, %v48_v13  ;;  %1764 = vmatpush3.msra.mxu1 %v709_v34 }
  0x1b   :  { %1739 = vmatprep.mubr.msk.f32.mxu0 %vm67_vm0, %v49_v14 }
  0x1e   :  { %1740 = vmatmul.mubr.msk.f32.gmra.mxu0 %vm67_vm0, %v50_v15 }
  0x1f   :  { %1742 = vmatprep.mubr.msk.f32.mxu0 %vm67_vm0, %v51_v16 }
  0x22   :  { %1743 = vmatmul.mubr.msk.f32.gmra.mxu0 %vm67_vm0, %v52_v17 }
  0x23   :  { %1745 = vmatprep.mubr.msk.f32.mxu0 %vm67_vm0, %v53_v18 }
  0x26   :  { %1746 = vmatmul.mubr.msk.f32.gmra.mxu0 %vm67_vm0, %v54_v19 }
  0x27   :  { %1748 = vmatprep.mubr.msk.f32.mxu0 %vm67_vm0, %v55_v20 }
  0x2a   :  { %1749 = vmatmul.mubr.msk.f32.gmra.mxu0 %vm67_vm0, %v56_v21 }
  0x2b   :  { %1751 = vmatprep.mubr.msk.f32.mxu0 %vm67_vm0, %v57_v22 }
  0x2e   :  { %1752 = vmatmul.mubr.msk.f32.gmra.mxu0 %vm67_vm0, %v58_v23 }
  0x2f   :  { %1754 = vmatprep.mubr.msk.f32.mxu0 %vm67_vm0, %v59_v24 }
  0x32   :  { %1755 = vmatmul.mubr.msk.f32.gmra.mxu0 %vm67_vm0, %v60_v25 }
  0x33   :  { %1809 = vmatprep.mubr.msk.f32.mxu0 %vm717_vm1, %v999_v33 }
  0x36   :  { %1810 = vmatmul.mubr.msk.f32.vlgmr.msra.gmra.mxu0 %vm717_vm1, %v1000_v35 }
  0xc6   :  { %v1723_v36 = vpop.f32.mrf.mxu0 }
  0xc7   :  { %v2141_v45 = vadd.f32 %v1723_v36, %v2138_v44 }
  0xc8   :  { %v206_v37 = vpop.f32.mrf.mxu0 }
  0xc9   :  { %v350_v47 = vand.u32 2147483647, %v2141_v45  ;;  %v2172_v7 = vadd.f32 %v2138_v44, %v206_v37  ;;  %v326_v33 = vmax.f32 %v2141_v45, 0.0 }
  0xca   :  { %v1726_v38 = vpop.f32.mrf.mxu0 }
  0xcb   :  { %v2145_v49 = vadd.f32 %v1726_v38, %v2138_v44  ;;  %v374_v50 = vsub.f32 0.0, %v350_v47  ;;  %v349_v15 = vand.u32 2147483647, %v2172_v7 }
  0xcc   :  { %v216_v39 = vpop.f32.mrf.mxu0 }
  0xcd   :  { %v2148_v52 = vadd.f32 %v2138_v44, %v216_v39  ;;  %v352_v53 = vand.u32 2147483647, %v2145_v49  ;;  %v399_v54 = vmul.f32 1.442695, %v374_v50  ;;  %v373_v24 = vsub.f32 0.0, %v349_v15 }
  0xce   :  { %v1729_v40 = vpop.f32.mrf.mxu0  ;;  %v328_v39 = vmax.f32 %v2145_v49, 0.0 }
  0xcf   :  { %v2152_v55 = vadd.f32 %v1729_v40, %v2138_v44  ;;  %v351_v57 = vand.u32 2147483647, %v2148_v52  ;;  %v376_v58 = vsub.f32 0.0, %v352_v53  ;;  %1829 = vpow2.f32 %v399_v54 }
  0xd0   :  { %v226_v41 = vpop.f32.mrf.mxu0  ;;  %v397_v31 = vmul.f32 1.442695, %v373_v24 }
  0xd1   :  { %v2156_v59 = vadd.f32 %v2138_v44, %v226_v41  ;;  %v354_v61 = vand.u32 2147483647, %v2152_v55  ;;  %v375_v63 = vsub.f32 0.0, %v351_v57  ;;  %v403_v0 = vmul.f32 1.442695, %v376_v58 }
  0xd2   :  { %v1732_v42 = vpop.f32.mrf.mxu0 }
  0xd3   :  { %v2159_v60 = vadd.f32 %v1732_v42, %v2138_v44  ;;  %v353_v1 = vand.u32 2147483647, %v2156_v59  ;;  %v378_v4 = vsub.f32 0.0, %v354_v61  ;;  %v401_v6 = vmul.f32 1.442695, %v375_v63 }
  0xd4   :  { %v236_v43 = vpop.f32.mrf.mxu0  ;;  %1831 = vpow2.f32 %v403_v0 }
  0xd5   :  { %v356_v2 = vand.u32 2147483647, %v2159_v60  ;;  %v2167_v3 = vadd.f32 %v2138_v44, %v236_v43  ;;  %v377_v8 = vsub.f32 0.0, %v353_v1  ;;  %v407_v11 = vmul.f32 1.442695, %v378_v4 }
  0xd6   :  { %v1735_v46 = vpop.f32.mrf.mxu0  ;;  %1833 = vpow2.f32 %v401_v6 }
  0xd7   :  { %v380_v9 = vsub.f32 0.0, %v356_v2  ;;  %v355_v10 = vand.u32 2147483647, %v2167_v3  ;;  %v2176_v12 = vadd.f32 %v1735_v46, %v2138_v44  ;;  %v405_v16 = vmul.f32 1.442695, %v377_v8 }
  0xd8   :  { %v246_v48 = vpop.f32.mrf.mxu0  ;;  %1835 = vpow2.f32 %v407_v11 }
  0xd9   :  { %v2181_v14 = vadd.f32 %v2138_v44, %v246_v48  ;;  %v411_v17 = vmul.f32 1.442695, %v380_v9  ;;  %v379_v18 = vsub.f32 0.0, %v355_v10  ;;  %v358_v19 = vand.u32 2147483647, %v2176_v12 }
  0xda   :  { %v1738_v51 = vpop.f32.mrf.mxu0  ;;  %1837 = vpow2.f32 %v405_v16 }
  0xdb   :  { %v2186_v20 = vadd.f32 %v1738_v51, %v2138_v44  ;;  %v357_v23 = vand.u32 2147483647, %v2181_v14  ;;  %1839 = vpow2.f32 %v411_v17  ;;  %v409_v25 = vmul.f32 1.442695, %v379_v18 }
  0xdc   :  { %v256_v56 = vpop.f32.mrf.mxu0  ;;  %v2190_v22 = vpop.eup %1829  ;;  %v382_v27 = vsub.f32 0.0, %v358_v19 }
  0xdd   :  { %v454_v26 = vadd.f32 1.0, %v2190_v22  ;;  %v360_v28 = vand.u32 2147483647, %v2186_v20  ;;  %v381_v30 = vsub.f32 0.0, %v357_v23  ;;  %v457_v34 = vmul.f32 -0.5, %v2190_v22 }
  0xde   :  { %v2162_v62 = vpop.f32.mrf.mxu0  ;;  %1841 = vpow2.f32 %v409_v25  ;;  %v415_v36 = vmul.f32 1.442695, %v382_v27  ;;  %v2207_v42 = vadd.f32 %v2138_v44, %v256_v56  ;;  %v460_v4 = vand.u32 2147483647, %v2190_v22 }
  0xdf   :  { %1843 = vlog2.f32 %v454_v26  ;;  %v384_v37 = vsub.f32 0.0, %v360_v28  ;;  %v413_v41 = vmul.f32 1.442695, %v381_v30  ;;  %v458_v50 = vadd.f32 1.0, %v457_v34 }
  0xe0   :  { %v2169_v5 = vpop.f32.mrf.mxu0  ;;  %1845 = vpow2.f32 %v397_v31  ;;  %v359_v1 = vand.u32 2147483647, %v2207_v42  ;;  %v2227_v2 = vadd.f32 %v2162_v62, %v2138_v44  ;;  %vm2256_vm2 = vcmp.lt.f32.partialorder %v460_v4, 0.0004427343 }
  0xe1   :  { %v2197_v32 = vpop.eup %1831  ;;  %1847 = vpow2.f32 %v415_v36  ;;  %v419_v58 = vmul.f32 1.442695, %v384_v37  ;;  %v2233_v8 = vadd.f32 %v2138_v44, %v2169_v5  ;;  %v2238_v10 = vmul.f32 %v2190_v22, %v458_v50 }
  0xe2   :  { %v2178_v13 = vpop.f32.mrf.mxu0  ;;  %v472_v46 = vadd.f32 1.0, %v2197_v32  ;;  %v475_v51 = vmul.f32 -0.5, %v2197_v32  ;;  %1849 = vpow2.f32 %v413_v41  ;;  %v478_v15 = vand.u32 2147483647, %v2197_v32 }
  0xe3   :  { %v2209_v43 = vpop.eup %1833  ;;  %v383_v24 = vsub.f32 0.0, %v359_v1  ;;  %v362_v25 = vand.u32 2147483647, %v2227_v2  ;;  %v361_v28 = vand.u32 2147483647, %v2233_v8 }
  0xe4   :  { %v2188_v21 = vpop.f32.mrf.mxu0  ;;  %v466_v0 = vmul.f32 -0.5, %v2209_v43  ;;  %1851 = vlog2.f32 %v472_v46  ;;  %v476_v11 = vadd.f32 1.0, %v475_v51  ;;  %v463_v62 = vadd.f32 1.0, %v2209_v43 }
  0xe5   :  { %v2221_v63 = vpop.eup %1835  ;;  %1853 = vpow2.f32 %v419_v58  ;;  %v469_v26 = vand.u32 2147483647, %v2209_v43  ;;  %v2254_v30 = vadd.f32 %v2138_v44, %v2188_v21  ;;  %v417_v1 = vmul.f32 1.442695, %v383_v24 }
  0xe6   :  { %v2195_v29 = vpop.f32.mrf.mxu0  ;;  %v490_v17 = vadd.f32 1.0, %v2221_v63  ;;  %v493_v18 = vmul.f32 -0.5, %v2221_v63  ;;  %v467_v23 = vadd.f32 1.0, %v466_v0  ;;  %v2261_v34 = vmul.f32 %v2197_v32, %v476_v11 }
  0xe7   :  { %v2235_v9 = vpop.eup %1837  ;;  %1855 = vlog2.f32 %v463_v62  ;;  %v496_v50 = vand.u32 2147483647, %v2221_v63  ;;  %v386_v4 = vsub.f32 0.0, %v362_v25  ;;  %v385_v62 = vsub.f32 0.0, %v361_v28 }
  0xe8   :  { %v2202_v38 = vpop.f32.mrf.mxu0  ;;  %v2242_v16 = vpop.eup %1839  ;;  %v484_v27 = vmul.f32 -0.5, %v2235_v9  ;;  %v481_v36 = vadd.f32 1.0, %v2235_v9  ;;  %1857 = vlog2.f32 %v490_v17  ;;  %v494_v46 = vadd.f32 1.0, %v493_v18 }
  0xe9   :  { %v511_v37 = vmul.f32 -0.5, %v2242_v16  ;;  %v508_v21 = vadd.f32 1.0, %v2242_v16  ;;  %v2272_v0 = vmul.f32 %v2209_v43, %v467_v23  ;;  %v2277_v17 = vadd.f32 %v2178_v13, %v2138_v44 }
  0xea   :  { %v2219_v61 = vpop.f32.mrf.mxu0  ;;  %v485_v11 = vadd.f32 1.0, %v484_v27  ;;  %v363_v18 = vand.u32 2147483647, %v2254_v30  ;;  %1859 = vlog2.f32 %v481_v36  ;;  %v2285_v23 = vadd.f32 %v2138_v44, %v2202_v38 }
  0xeb   :  { %v2265_v41 = vpop.eup %1841  ;;  %v512_v5 = vadd.f32 1.0, %v511_v37  ;;  %v2288_v25 = vmul.f32 %v2221_v63, %v494_v46  ;;  %1861 = vlog2.f32 %v508_v21  ;;  %vm2293_vm3 = vcmp.lt.f32.partialorder %v478_v15, 0.0004427343 }
  0xec   :  { %v296_v19 = vpop.f32.mrf.mxu0  ;;  %v1844_v58 = vpop.eup %1843  ;;  %v499_v6 = vadd.f32 1.0, %v2265_v41  ;;  %v502_v13 = vmul.f32 -0.5, %v2265_v41  ;;  %1863 = vpow2.f32 %v417_v1  ;;  %v423_v38 = vmul.f32 1.442695, %v386_v4 }
  0xed   :  { %v2280_v22 = vpop.eup %1845  ;;  %v456_v24 = vmul.f32 0.6931472, %v1844_v58  ;;  %v2302_v46 = vmul.f32 %v2235_v9, %v485_v11  ;;  %v421_v21 = vmul.f32 1.442695, %v385_v62  ;;  %v364_v57 = vand.u32 2147483647, %v2277_v17 }
  0xee   :  { %v2269_v51 = vpop.f32.mrf.mxu0  ;;  %v2291_v28 = vpop.eup %1847  ;;  %v387_v54 = vsub.f32 0.0, %v363_v18  ;;  %v2306_v15 = vmul.f32 %v2242_v16, %v512_v5  ;;  %1865 = vlog2.f32 %v499_v6  ;;  %v365_v53 = vand.u32 2147483647, %v2285_v23 }
  0xef   :  { %v2299_v58 = vpop.eup %1849  ;;  %v2310_v48 = vadd.f32 %v2138_v44, %v296_v19  ;;  %v462_v1 = vsel %vm2256_vm2, %v2238_v10, %v456_v24  ;;  %v503_v4 = vadd.f32 1.0, %v502_v13  ;;  %v526_v11 = vadd.f32 1.0, %v2291_v28 }
  0xf0   :  { %v306_v27 = vpop.f32.mrf.mxu0  ;;  %v2318_v62 = vadd.f32 %v2195_v29, %v2138_v44  ;;  %v529_v6 = vmul.f32 -0.5, %v2291_v28  ;;  %v517_v47 = vadd.f32 1.0, %v2299_v58  ;;  %1867 = vpow2.f32 %v423_v38 }
  0xf1   :  { %v1852_v35 = vpop.eup %1851  ;;  %1869 = vpow2.f32 %v421_v21  ;;  %v388_v10 = vsub.f32 0.0, %v364_v57  ;;  %v425_v24 = vmul.f32 1.442695, %v387_v54  ;;  %v662_v13 = vadd.f32 %v462_v1, %v326_v33 }
  0xf2   :  { %v2320_v18 = vpop.f32.mrf.mxu0  ;;  %v2322_v5 = vpop.eup %1853  ;;  %v474_v31 = vmul.f32 0.6931472, %v1852_v35  ;;  %v389_v29 = vsub.f32 0.0, %v365_v53  ;;  %v367_v37 = vand.u32 2147483647, %v2310_v48  ;;  %v2331_v40 = vadd.f32 %v2138_v44, %v306_v27 }
  0xf3   :  { %1871 = vlog2.f32 %v526_v11  ;;  %v544_v19 = vadd.f32 1.0, %v2322_v5  ;;  %v366_v32 = vand.u32 2147483647, %v2318_v62  ;;  %v2337_v35 = vadd.f32 %v2219_v61, %v2138_v44 }
  0xf4   :  { %v1856_v36 = vpop.eup %1855  ;;  %v316_v54 = vpop.f32.mrf.mxu0  ;;  %v2340_v45 = vmul.f32 %v2265_v41, %v503_v4  ;;  %v530_v33 = vadd.f32 1.0, %v529_v6  ;;  %1873 = vlog2.f32 %v517_v47  ;;  %v520_v53 = vmul.f32 -0.5, %v2299_v58 }
  0xf5   :  { %2976 = vst [vmem:[#allocation5_spill] sm:$0xff] %v2337_v35  ;;  %v1858_v57 = vpop.eup %1857  ;;  %v480_v27 = vsel %vm2293_vm3, %v2261_v34, %v474_v31  ;;  %vm2348_vm4 = vcmp.lt.f32.partialorder %v469_v26, 0.0004427343  ;;  %v427_v61 = vmul.f32 1.442695, %v388_v10  ;;  %1875 = vpow2.f32 %v425_v24  ;;  %v1090_v34 = vld [vmem:[%s2961_s3] sm:$0xff] }
  0xf6   :  { %v445_v21 = vadd.f32 1.0, %v2280_v22  ;;  %v429_v1 = vmul.f32 1.442695, %v389_v29  ;;  %v391_v4 = vsub.f32 0.0, %v367_v37  ;;  %v369_v47 = vand.u32 2147483647, %v2331_v40 }
  0xf7   :  { %v2355_v11 = vadd.f32 %v2138_v44, %v316_v54  ;;  %v1860_v6 = vpop.eup %1859  ;;  %1877 = vlog2.f32 %v544_v19  ;;  %v390_v56 = vsub.f32 0.0, %v366_v32  ;;  %v368_v43 = vand.u32 2147483647, %v2337_v35  ;;  %v1092_v37 = vld [vmem:[%s2961_s3 + $0x10] sm:$0xff]  ;;  %v1097_v32 = vld [vmem:[%s2961_s3 + $0x38] sm:$0xff] }
  0xf8   :  { %v2360_v26 = vadd.f32 %v2269_v51, %v2138_v44  ;;  %v1862_v31 = vpop.eup %1861  ;;  %v2368_v10 = vadd.f32 -0.6931472, %v662_v13  ;;  %vm2372_vm5 = vcmp.lt.f32.partialorder %v496_v50, 0.0004427343  ;;  %v521_v19 = vadd.f32 1.0, %v520_v53  ;;  %v1091_v53 = vld [vmem:[%s2961_s3 + $0x8] sm:$0xff] }
  0xf9   :  { %2979 = vst [vmem:[#allocation6_spill] sm:$0xff] %v2355_v11  ;;  %1879 = vlog2.f32 %v445_v21  ;;  %v2376_v51 = vpop.eup %1863  ;;  %v664_v24 = vadd.f32 %v480_v27, %v328_v39  ;;  %v465_v29 = vmul.f32 0.6931472, %v1856_v36  ;;  %v547_v54 = vmul.f32 -0.5, %v2322_v5 }
  0xfa   :  { %2980 = vst [vmem:[#allocation7_spill] sm:$0xff] %v2360_v26  ;;  %1881 = vpow2.f32 %v427_v61  ;;  %v1947_v35 = vmov 0   ;;  %v433_v63 = vmul.f32 1.442695, %v391_v4  ;;  %v393_v50 = vsub.f32 0.0, %v369_v47 }
  0xfb   :  { %1827 = vset.pattern.permute.xlu0 %v1947_v35  ;;  %1828 = vset.pattern.permute.xlu1 %v1947_v35  ;;  %1883 = vpow2.f32 %v429_v1  ;;  %v371_v13 = vand.u32 2147483647, %v2355_v11  ;;  %v2385_v49 = vpop.eup %1865  ;;  %v2983_v39 = vand.u32 2147483647, %v2235_v9  ;;  %v431_v35 = vmul.f32 1.442695, %v390_v56 }
  0xfc   :  { %1116 = vperm.xlu0 %1827, %v1090_v34   ;;  %1126 = vperm.xlu1 %1828, %v1092_v37   ;;  %v392_v27 = vsub.f32 0.0, %v368_v43  ;;  %v370_v61 = vand.u32 2147483647, %v2360_v26  ;;  %v2396_v21 = vadd.f32 %v2320_v18, %v2138_v44  ;;  %v1093_v1 = vld [vmem:[%s2961_s3 + $0x18] sm:$0xff]  ;;  %v492_v4 = vmul.f32 0.6931472, %v1858_v57 }
  0xfd   :  { %vm2389_vm6 = vcmp.lt.f32.partialorder %v2983_v39, 0.0004427343  ;;  %v2402_v47 = vmul.f32 %v2291_v28, %v530_v33  ;;  %v523_v9 = vand.u32 2147483647, %v2299_v58  ;;  %v535_v34 = vadd.f32 1.0, %v2376_v51  ;;  %v2406_v56 = vpop.eup %1867 }
  0xfe   :  { %2986 = vst [vmem:[#allocation8_spill] sm:$0xff] %v2396_v21  ;;  %v2408_v43 = vadd.f32 -0.6931472, %v664_v24  ;;  %v2987_v37 = vand.u32 2147483647, %v2242_v16  ;;  %v2417_v18 = vmul.f32 %v2299_v58, %v521_v19  ;;  %v548_v57 = vadd.f32 1.0, %v547_v54  ;;  %v2420_v39 = vpop.eup %1869 }
  0xff   :  { %v550_v33 = vand.u32 2147483647, %v2322_v5  ;;  %v471_v26 = vsel %vm2348_vm4, %v2272_v0, %v465_v29  ;;  %1885 = vpow2.f32 %v433_v63  ;;  %v437_v24 = vmul.f32 1.442695, %v393_v50  ;;  %v1095_v16 = vld [vmem:[%s2961_s3 + $0x28] sm:$0xff] }
 0x100   :  { %vm2412_vm7 = vcmp.lt.f32.partialorder %v2987_v37, 0.0004427343  ;;  %v395_v11 = vsub.f32 0.0, %v371_v13  ;;  %1121 = vperm.xlu0 %1827, %v1091_v53   ;;  %1131 = vperm.xlu1 %1828, %v1093_v1   ;;  %1887 = vpow2.f32 %v431_v35  ;;  %v435_v58 = vmul.f32 1.442695, %v392_v27  ;;  %v1094_v37 = vld [vmem:[%s2961_s3 + $0x20] sm:$0xff]  ;;  %v1872_v38 = vpop.eup %1871 }
 0x101   :  { %v394_v19 = vsub.f32 0.0, %v370_v61  ;;  %v372_v54 = vand.u32 2147483647, %v2396_v21  ;;  %v483_v0 = vmul.f32 0.6931472, %v1860_v6  ;;  %1889 = vlog2.f32 %v535_v34  ;;  %v1874_v50 = vpop.eup %1873 }
 0x102   :  { %v562_v29 = vadd.f32 1.0, %v2406_v56  ;;  %v448_v63 = vmul.f32 -0.5, %v2280_v22  ;;  %v2990_v13 = vmax.f32 %v2148_v52, 0.0  ;;  %v498_v35 = vsel %vm2372_vm5, %v2288_v25, %v492_v4  ;;  %v2447_v34 = vpop.eup %1875 }
 0x103   :  { %v2991_v27 = vand.u32 2147483647, %v2265_v41  ;;  %v337_v6 = vmax.f32 %v2233_v8, 0.0  ;;  %v553_v1 = vadd.f32 1.0, %v2420_v39  ;;  %v510_v21 = vmul.f32 0.6931472, %v1862_v31 }
 0x104   :  { %v663_v53 = vadd.f32 %v471_v26, %v2990_v13  ;;  %v2994_v52 = vand.u32 2147483647, %v2291_v28  ;;  %v2456_v25 = vmul.f32 %v2322_v5, %v548_v57  ;;  %1891 = vpow2.f32 %v437_v24  ;;  %1141 = vperm.xlu1 %1828, %v1095_v16   ;;  %1136 = vperm.xlu0 %1827, %v1094_v37   ;;  %v1878_v57 = vpop.eup %1877 }
 0x105   :  { %vm2441_vm8 = vcmp.lt.f32.partialorder %v2991_v27, 0.0004427343  ;;  %v441_v41 = vmul.f32 1.442695, %v395_v11  ;;  %vm2461_vm10 = vcmp.lt.f32.partialorder %v523_v9, 0.0004427343  ;;  %1893 = vpow2.f32 %v435_v58 }
 0x106   :  { %vm2451_vm9 = vcmp.lt.f32.partialorder %v2994_v52, 0.0004427343  ;;  %vm2465_vm11 = vcmp.lt.f32.partialorder %v550_v33, 0.0004427343  ;;  %v439_v31 = vmul.f32 1.442695, %v394_v19  ;;  %v489_v9 = vsel %vm2389_vm6, %v2302_v46, %v483_v0  ;;  %v1880_v37 = vpop.eup %1879 }
 0x107   :  { %v396_v5 = vsub.f32 0.0, %v372_v54  ;;  %v1096_v11 = vld [vmem:[%s2961_s3 + $0x30] sm:$0xff]  ;;  %v3001_v24 = vmax.f32 %v2152_v55, 0.0  ;;  %1895 = vlog2.f32 %v562_v29  ;;  %v449_v33 = vadd.f32 1.0, %v448_v63  ;;  %v2481_v54 = vpop.eup %1881 }
 0x108   :  { %v2477_v13 = vadd.f32 -0.6931472, %v663_v53  ;;  %v538_v58 = vmul.f32 -0.5, %v2376_v51  ;;  %1897 = vlog2.f32 %v553_v1  ;;  %v451_v19 = vand.u32 2147483647, %v2280_v22  ;;  %1151 = vperm.xlu1 %1828, %v1097_v32   ;;  %1146 = vperm.xlu0 %1827, %v1096_v11   ;;  %v2488_v36 = vpop.eup %1883 }
 0x109   :  { %v666_v16 = vadd.f32 %v498_v35, %v3001_v24  ;;  %v516_v55 = vsel %vm2412_vm7, %v2306_v15, %v510_v21  ;;  %v501_v35 = vmul.f32 0.6931472, %v2385_v49  ;;  %v571_v46 = vadd.f32 1.0, %v2447_v34 }
 0x10a   :  { %1899 = vpow2.f32 %v441_v41  ;;  %v3002_v0 = vmax.f32 %v2156_v59, 0.0  ;;  %v528_v63 = vmul.f32 0.6931472, %v1872_v38  ;;  %v443_v53 = vmul.f32 1.442695, %v396_v5 }
 0x10b   :  { %1901 = vpow2.f32 %v439_v31  ;;  %v519_v27 = vmul.f32 0.6931472, %v1874_v50  ;;  %v546_v1 = vmul.f32 0.6931472, %v1878_v57  ;;  %v447_v52 = vmul.f32 0.6931472, %v1880_v37 }
 0x10c   :  { %v665_v29 = vadd.f32 %v489_v9, %v3002_v0  ;;  %v450_v15 = vmul.f32 %v2280_v22, %v449_v33  ;;  %v2493_v21 = vadd.f32 -0.6931472, %v666_v16  ;;  %v3003_v49 = vmax.f32 %v2159_v60, 0.0  ;;  %v2502_v32 = vpop.eup %1885 }
 0x10d   :  { %v541_v41 = vand.u32 2147483647, %v2376_v51  ;;  %vm452_vm12 = vcmp.lt.f32.partialorder %v451_v19, 0.0004427343  ;;  %v507_v59 = vsel %vm2441_vm8, %v2340_v45, %v501_v35  ;;  %1903 = vlog2.f32 %v571_v46  ;;  %v2510_v11 = vpop.eup %1887 }
 0x10e   :  { %v668_v44 = vadd.f32 %v516_v55, %v3003_v49  ;;  %v589_v38 = vadd.f32 1.0, %v2488_v36  ;;  %v453_v50 = vsel %vm452_vm12, %v450_v15, %v447_v52  ;;  %v534_v22 = vsel %vm2451_vm9, %v2402_v47, %v528_v63  ;;  %v1890_v26 = vpop.eup %1889 }
 0x10f   :  { %v580_v60 = vadd.f32 1.0, %v2481_v54  ;;  %1905 = vpow2.f32 %v443_v53  ;;  %v3004_v31 = vmax.f32 %v2172_v7, 0.0  ;;  %v1600_v61 = vadd.f32 -0.6931472, %v665_v29 }
 0x110   :  { %v525_v45 = vsel %vm2461_vm10, %v2417_v18, %v519_v27  ;;  %v552_v57 = vsel %vm2465_vm11, %v2456_v25, %v546_v1  ;;  %v539_v24 = vadd.f32 1.0, %v538_v58  ;;  %vm2518_vm13 = vcmp.lt.f32.partialorder %v541_v41, 0.0004427343 }
 0x111   :  { %v661_v5 = vadd.f32 %v453_v50, %v3004_v31  ;;  %v565_v7 = vmul.f32 -0.5, %v2406_v56  ;;  %v340_v16 = vmax.f32 %v2277_v17, 0.0  ;;  %v3007_v33 = vmax.f32 %v2167_v3, 0.0  ;;  %v2529_v28 = vpop.eup %1891 }
 0x112   :  { %v3008_v18 = vmax.f32 %v2176_v12, 0.0  ;;  %1907 = vlog2.f32 %v589_v38  ;;  %v607_v25 = vadd.f32 1.0, %v2502_v32  ;;  %v3009_v58 = vmax.f32 %v2181_v14, 0.0  ;;  %v2537_v3 = vpop.eup %1893 }
 0x113   :  { %v1596_v9 = vadd.f32 -0.6931472, %v661_v5  ;;  %v667_v37 = vadd.f32 %v507_v59, %v3007_v33  ;;  %v3010_v55 = vmax.f32 %v2186_v20, 0.0  ;;  %1909 = vlog2.f32 %v580_v60 }
 0x114   :  { %v670_v4 = vadd.f32 %v534_v22, %v3008_v18  ;;  %v669_v19 = vadd.f32 %v525_v45, %v3009_v58  ;;  %v598_v46 = vadd.f32 1.0, %v2510_v11  ;;  %v2539_v12 = vadd.f32 -0.6931472, %v668_v44  ;;  %v1896_v14 = vpop.eup %1895 }
 0x115   :  { %v672_v35 = vadd.f32 %v552_v57, %v3010_v55  ;;  %1765 = vmatprep.mubr.msk.f32.mxu1 %vm717_vm1, %v1596_v9  ;;  %v537_v0 = vmul.f32 0.6931472, %v1890_v26  ;;  %v540_v29 = vmul.f32 %v2376_v51, %v539_v24  ;;  %v556_v63 = vmul.f32 -0.5, %v2420_v39  ;;  %v1898_v52 = vpop.eup %1897 }
 0x116   :  { %1766 = vmatmul.mubr.msk.f32.vlgmr.msra.gmra.mxu1 %vm717_vm1, %v2368_v10  ;;  %v566_v20 = vadd.f32 1.0, %v565_v7  ;;  %v568_v53 = vand.u32 2147483647, %v2406_v56  ;;  %v339_v27 = vmax.f32 %v2254_v30, 0.0  ;;  %v342_v1 = vmax.f32 %v2318_v62, 0.0 }
 0x117   :  { %1768 = vmatprep.mubr.msk.f32.mxu1 %vm717_vm1, %v2477_v13  ;;  %v1602_v15 = vadd.f32 -0.6931472, %v667_v37  ;;  %v2550_v49 = vadd.f32 -0.6931472, %v670_v4  ;;  %1911 = vlog2.f32 %v607_v25  ;;  %v625_v51 = vadd.f32 1.0, %v2529_v28  ;;  %v2553_v44 = vpop.eup %1899 }
 0x118   :  { %v1604_v10 = vadd.f32 -0.6931472, %v669_v19  ;;  %v2555_v41 = vadd.f32 -0.6931472, %v672_v35  ;;  %1913 = vlog2.f32 %v598_v46  ;;  %v616_v59 = vadd.f32 1.0, %v2537_v3  ;;  %v2558_v38 = vpop.eup %1901 }
 0x119   :  { %v543_v13 = vsel %vm2518_vm13, %v540_v29, %v537_v0  ;;  %v564_v50 = vmul.f32 0.6931472, %v1896_v14  ;;  %v557_v22 = vadd.f32 1.0, %v556_v63  ;;  %v574_v60 = vmul.f32 -0.5, %v2447_v34 }
 0x11a   :  { %1769 = vmatmul.mubr.msk.f32.gmra.mxu1 %vm717_vm1, %v2408_v43  ;;  %v567_v31 = vmul.f32 %v2406_v56, %v566_v20  ;;  %vm2566_vm14 = vcmp.lt.f32.partialorder %v568_v53, 0.0004427343  ;;  %v559_v45 = vand.u32 2147483647, %v2420_v39  ;;  %v341_v57 = vmax.f32 %v2285_v23, 0.0  ;;  %v1904_v7 = vpop.eup %1903 }
 0x11b   :  { %1771 = vmatprep.mubr.msk.f32.mxu1 %vm717_vm1, %v1600_v61  ;;  %v555_v24 = vmul.f32 0.6931472, %v1898_v52  ;;  %v583_v26 = vmul.f32 -0.5, %v2481_v54  ;;  %1915 = vlog2.f32 %v625_v51  ;;  %v643_v47 = vadd.f32 1.0, %v2553_v44 }
 0x11c   :  { %v3013_v43 = vmax.f32 %v2207_v42, 0.0  ;;  %1917 = vlog2.f32 %v616_v59  ;;  %v343_v9 = vmax.f32 %v2310_v48, 0.0  ;;  %v634_v33 = vadd.f32 1.0, %v2558_v38  ;;  %v2579_v37 = vpop.eup %1905 }
 0x11d   :  { %v570_v61 = vsel %vm2566_vm14, %v567_v31, %v564_v50  ;;  %v558_v18 = vmul.f32 %v2420_v39, %v557_v22  ;;  %v575_v4 = vadd.f32 1.0, %v574_v60  ;;  %v592_v25 = vmul.f32 -0.5, %v2488_v36 }
 0x11e   :  { %v671_v56 = vadd.f32 %v543_v13, %v3013_v43  ;;  %1772 = vmatmul.mubr.msk.f32.gmra.mxu1 %vm717_vm1, %v2493_v21  ;;  %vm2587_vm15 = vcmp.lt.f32.partialorder %v559_v45, 0.0004427343  ;;  %v586_v58 = vand.u32 2147483647, %v2481_v54  ;;  %v577_v19 = vand.u32 2147483647, %v2447_v34 }
 0x11f   :  { %1774 = vmatprep.mubr.msk.f32.mxu1 %vm717_vm1, %v1602_v15  ;;  %v561_v55 = vsel %vm2587_vm15, %v558_v18, %v555_v24  ;;  %v584_v39 = vadd.f32 1.0, %v583_v26  ;;  %v573_v35 = vmul.f32 0.6931472, %v1904_v7  ;;  %1919 = vlog2.f32 %v643_v47  ;;  %v1908_v46 = vpop.eup %1907 }
 0x120   :  { %v1606_v0 = vadd.f32 -0.6931472, %v671_v56  ;;  %v3016_v21 = vmax.f32 %v2227_v2, 0.0  ;;  %1921 = vlog2.f32 %v634_v33  ;;  %v652_v63 = vadd.f32 1.0, %v2579_v37  ;;  %v1910_v14 = vpop.eup %1909 }
 0x121   :  { %v576_v20 = vmul.f32 %v2447_v34, %v575_v4  ;;  %v601_v53 = vmul.f32 -0.5, %v2510_v11  ;;  %v593_v52 = vadd.f32 1.0, %v592_v25  ;;  %v610_v15 = vmul.f32 -0.5, %v2502_v32 }
 0x122   :  { %v674_v29 = vadd.f32 %v570_v61, %v3016_v21  ;;  %1775 = vmatmul.mubr.msk.f32.gmra.mxu1 %vm717_vm1, %v2539_v12  ;;  %v673_v51 = vadd.f32 %v561_v55, %v337_v6  ;;  %vm2606_vm0 = vcmp.lt.f32.partialorder %v586_v58, 0.0004427343  ;;  %vm2610_vm2 = vcmp.lt.f32.partialorder %v577_v19, 0.0004427343  ;;  %v2735_v21 = vld [vmem:[%s2966_s8 + $0x1] ss:$0 sm:$0xff] }
 0x123   :  { %v595_v34 = vand.u32 2147483647, %v2488_v36  ;;  %1777 = vmatprep.mubr.msk.f32.mxu1 %vm717_vm1, %v1604_v10  ;;  %v585_v13 = vmul.f32 %v2481_v54, %v584_v39  ;;  %v579_v12 = vsel %vm2610_vm2, %v576_v20, %v573_v35  ;;  %v604_v8 = vand.u32 2147483647, %v2510_v11 }
 0x124   :  { %v591_v6 = vmul.f32 0.6931472, %v1908_v46  ;;  %v1912_v50 = vpop.eup %1911  ;;  %v1609_v22 = vadd.f32 -0.6931472, %v674_v29  ;;  %v582_v60 = vmul.f32 0.6931472, %v1910_v14  ;;  %1923 = vlog2.f32 %v652_v63 }
 0x125   :  { %v619_v31 = vmul.f32 -0.5, %v2537_v3  ;;  %v1914_v5 = vpop.eup %1913  ;;  %v602_v45 = vadd.f32 1.0, %v601_v53  ;;  %v594_v24 = vmul.f32 %v2488_v36, %v593_v52  ;;  %v611_v26 = vadd.f32 1.0, %v610_v15 }
 0x126   :  { %v628_v10 = vmul.f32 -0.5, %v2529_v28  ;;  %1778 = vmatmul.mubr.msk.f32.gmra.mxu1 %vm717_vm1, %v2550_v49  ;;  %v1608_v54 = vadd.f32 -0.6931472, %v673_v51  ;;  %v675_v47 = vadd.f32 %v579_v12, %v339_v27  ;;  %vm2627_vm3 = vcmp.lt.f32.partialorder %v595_v34, 0.0004427343 }
 0x127   :  { %v613_v43 = vand.u32 2147483647, %v2502_v32  ;;  %1780 = vmatprep.mubr.msk.f32.mxu1 %vm717_vm1, %v1606_v0  ;;  %vm2633_vm4 = vcmp.lt.f32.partialorder %v604_v8, 0.0004427343  ;;  %v597_v56 = vsel %vm2627_vm3, %v594_v24, %v591_v6  ;;  %v622_v49 = vand.u32 2147483647, %v2537_v3 }
 0x128   :  { %v609_v33 = vmul.f32 0.6931472, %v1912_v50  ;;  %v1916_v30 = vpop.eup %1915  ;;  %v588_v27 = vsel %vm2606_vm0, %v585_v13, %v582_v60  ;;  %v600_v61 = vmul.f32 0.6931472, %v1914_v5  ;;  %v620_v18 = vadd.f32 1.0, %v619_v31  ;;  %v3031_v6 = vld [vmem:[#allocation5_spill] sm:$0xff] }
 0x129   :  { %v637_v4 = vmul.f32 -0.5, %v2558_v38  ;;  %v1918_v25 = vpop.eup %1917  ;;  %v612_v42 = vmul.f32 %v2502_v32, %v611_v26  ;;  %v629_v58 = vadd.f32 1.0, %v628_v10  ;;  %v631_v19 = vand.u32 2147483647, %v2529_v28 }
 0x12a   :  { %v646_v55 = vmul.f32 -0.5, %v2553_v44  ;;  %1781 = vmatmul.mubr.msk.f32.gmra.mxu1 %vm717_vm1, %v2555_v41  ;;  %v1610_v39 = vadd.f32 -0.6931472, %v675_v47  ;;  %v603_v35 = vmul.f32 %v2510_v11, %v602_v45  ;;  %v677_v46 = vadd.f32 %v597_v56, %v341_v57 }
 0x12b   :  { %vm2651_vm5 = vcmp.lt.f32.partialorder %v613_v43, 0.0004427343  ;;  %1783 = vmatprep.mubr.msk.f32.mxu1 %vm717_vm1, %v1608_v54  ;;  %v676_v32 = vadd.f32 %v588_v27, %v340_v16  ;;  %vm2658_vm6 = vcmp.lt.f32.partialorder %v622_v49, 0.0004427343  ;;  %v627_v11 = vmul.f32 0.6931472, %v1916_v30 }
 0x12c   :  { %v615_v41 = vsel %vm2651_vm5, %v612_v42, %v609_v33  ;;  %v1920_v29 = vpop.eup %1919  ;;  %v606_v23 = vsel %vm2633_vm4, %v603_v35, %v600_v61  ;;  %v618_v57 = vmul.f32 0.6931472, %v1918_v25  ;;  %v621_v63 = vmul.f32 %v2537_v3, %v620_v18  ;;  %v3034_v54 = vld [vmem:[#allocation6_spill] sm:$0xff]  ;;  %v3036_v27 = vld [vmem:[#allocation8_spill] sm:$0xff] }
 0x12d   :  { %v640_v14 = vand.u32 2147483647, %v2558_v38  ;;  %v1922_v20 = vpop.eup %1921  ;;  %v638_v17 = vadd.f32 1.0, %v637_v4  ;;  %v630_v16 = vmul.f32 %v2529_v28, %v629_v58  ;;  %vm2669_vm7 = vcmp.lt.f32.partialorder %v631_v19, 0.0004427343  ;;  %v1432_v42 = vld [vmem:[%s2965_s7 + $0x18] sm:$0xff] }
 0x12e   :  { %v647_v52 = vadd.f32 1.0, %v646_v55  ;;  %1784 = vmatmul.mubr.msk.f32.gmra.mxu1 %vm717_vm1, %v1609_v22  ;;  %v1612_v15 = vadd.f32 -0.6931472, %v677_v46  ;;  %v679_v51 = vadd.f32 %v615_v41, %v343_v9  ;;  %v655_v2 = vmul.f32 -0.5, %v2579_v37  ;;  %1812 = vmatprep.subr.mxu1 %v1432_v42  ;;  %v1431_v58 = vld [vmem:[%s2965_s7 + $0x10] sm:$0xff]  ;;  %v1430_v19 = vld [vmem:[%s2965_s7 + $0x8] sm:$0xff] }
 0x12f   :  { %v649_v3 = vand.u32 2147483647, %v2553_v44  ;;  %1786 = vmatprep.mubr.msk.f32.mxu1 %vm717_vm1, %v1610_v39  ;;  %v1611_v59 = vadd.f32 -0.6931472, %v676_v32  ;;  %v678_v28 = vadd.f32 %v606_v23, %v342_v1  ;;  %v633_v34 = vsel %vm2669_vm7, %v630_v16, %v627_v11  ;;  %1813 = vmatpush3.msra.mxu1 %v1432_v42  ;;  %v1429_v55 = vld [vmem:[%s2965_s7] sm:$0xff]  ;;  %v2721_v39 = vpop.f32.mrf.mxu0 }
 0x130   :  { %v645_v13 = vmul.f32 0.6931472, %v1920_v29  ;;  %v624_v12 = vsel %vm2658_vm6, %v621_v63, %v618_v57  ;;  %v636_v8 = vmul.f32 0.6931472, %v1922_v20  ;;  %v345_v48 = vmax.f32 %v2331_v40, 0.0  ;;  %1814 = vmatprep.subr.mxu1 %v1431_v58 }
 0x131   :  { %v1924_v9 = vpop.eup %1923  ;;  %v344_v50 = vmax.f32 %v3031_v6, 0.0  ;;  %v639_v22 = vmul.f32 %v2558_v38, %v638_v17  ;;  %vm2688_vm8 = vcmp.lt.f32.partialorder %v640_v14, 0.0004427343  ;;  %v648_v62 = vmul.f32 %v2553_v44, %v647_v52  ;;  %v3035_v44 = vld [vmem:[#allocation7_spill] sm:$0xff]  ;;  %1815 = vmatpush3.msra.mxu1 %v1431_v58  ;;  %v1081_v0 = vpop.f32.mrf.mxu0 }
 0x132   :  { %1787 = vmatmul.mubr.msk.f32.gmra.mxu1 %vm717_vm1, %v1611_v59  ;;  %v1614_v1 = vadd.f32 -0.6931472, %v679_v51  ;;  %v681_v31 = vadd.f32 %v633_v34, %v345_v48  ;;  %v656_v5 = vadd.f32 1.0, %v655_v2  ;;  %vm650_vm9 = vcmp.lt.f32.partialorder %v649_v3, 0.0004427343  ;;  %1816 = vmatprep.subr.mxu1 %v1430_v19 }
 0x133   :  { %1789 = vmatprep.mubr.msk.f32.mxu1 %vm717_vm1, %v1612_v15  ;;  %v1613_v40 = vadd.f32 -0.6931472, %v678_v28  ;;  %v680_v45 = vadd.f32 %v624_v12, %v344_v50  ;;  %v658_v24 = vand.u32 2147483647, %v2579_v37  ;;  %v651_v26 = vsel %vm650_vm9, %v648_v62, %v645_v13  ;;  %1817 = vmatpush3.msra.mxu1 %v1430_v19  ;;  %v2728_v46 = vld [vmem:[%s2966_s8 + $0x2] ss:$0 sm:$0xff] }
 0x134   :  { %v642_v38 = vsel %vm2688_vm8, %v639_v22, %v636_v8  ;;  %v654_v10 = vmul.f32 0.6931472, %v1924_v9  ;;  %v347_v47 = vmax.f32 %v3034_v54, 0.0  ;;  %v346_v7 = vmax.f32 %v3035_v44, 0.0  ;;  %1818 = vmatprep.subr.mxu1 %v1429_v55  ;;  %v2782_v42 = vld [vmem:[%s2960_s2] sm:$0xf] }
 0x135   :  { %v1616_v43 = vadd.f32 -0.6931472, %v681_v31  ;;  %v657_v36 = vmul.f32 %v2579_v37, %v656_v5  ;;  %v1615_v49 = vadd.f32 -0.6931472, %v680_v45  ;;  %vm659_vm10 = vcmp.lt.f32.partialorder %v658_v24, 0.0004427343  ;;  %1819 = vmatpush3.msra.mxu1 %v1429_v55 }
 0x136   :  { %1790 = vmatmul.mubr.msk.f32.gmra.mxu1 %vm717_vm1, %v1613_v40  ;;  %v683_v56 = vadd.f32 %v651_v26, %v347_v47  ;;  %v682_v33 = vadd.f32 %v642_v38, %v346_v7  ;;  %v348_v61 = vmax.f32 %v3036_v27, 0.0  ;;  %v2738_v41 = vadd.f32 %v2728_v46, %v1081_v0 }
 0x137   :  { %1792 = vmatprep.mubr.msk.f32.mxu1 %vm717_vm1, %v1614_v1  ;;  %v660_v30 = vsel %vm659_vm10, %v657_v36, %v654_v10  ;;  %vm1300_vm11 = vcmask 257024   ;;  %vm1453_vm12 = vcmask 1041409   ;;  %vm1455_vm13 = vcmask 1042434  }
 0x138   :  { %v1618_v18 = vadd.f32 -0.6931472, %v683_v56  ;;  %v1617_v4 = vadd.f32 -0.6931472, %v682_v33  ;;  %v684_v25 = vadd.f32 %v660_v30, %v348_v61  ;;  %vm1457_vm14 = vcmask 1043459  }
 0x139   :  { %vm1459_vm15 = vcmask 1044484   ;;  %vm1461_vm0 = vcmask 1045509   ;;  %vm1463_vm2 = vcmask 1046534   ;;  %vm1465_vm3 = vcmask 1047559  }
 0x13a   :  { %1793 = vmatmul.mubr.msk.f32.gmra.mxu1 %vm717_vm1, %v1615_v49  ;;  %v1619_v37 = vadd.f32 -0.6931472, %v684_v25 }
 0x13b   :  { %1795 = vmatprep.mubr.msk.f32.mxu1 %vm717_vm1, %v1616_v43 }
 0x13e   :  { %1796 = vmatmul.mubr.msk.f32.gmra.mxu1 %vm717_vm1, %v1617_v4 }
 0x13f   :  { %1798 = vmatprep.mubr.msk.f32.mxu1 %vm717_vm1, %v1618_v18 }
 0x142   :  { %1799 = vmatmul.mubr.msk.f32.gmra.mxu1 %vm717_vm1, %v1619_v37 }
 0x177   :  { %v2723_v35 = vpop.permute.xlu0 %1116  ;;  %v2730_v32 = vpop.permute.xlu1 %1126 }
 0x17b   :  { %v2741_v23 = vpop.permute.xlu0 %1121  ;;  %v2743_v63 = vpop.permute.xlu1 %1131 }
 0x17f   :  { %v2754_v13 = vpop.permute.xlu1 %1141  ;;  %v2764_v26 = vpop.permute.xlu0 %1136 }
 0x183   :  { %v2770_v7 = vpop.permute.xlu1 %1151 }
 0x1d6   :  { %v1767_v11 = vpop.f32.mrf.mxu1 }
 0x1d7   :  { %v862_v29 = vadd.f32 %v1767_v11, %v2735_v21 }
 0x1d8   :  { %v856_v57 = vpop.f32.mrf.mxu1 }
 0x1d9   :  { %v857_v14 = vadd.f32 %v2735_v21, %v856_v57  ;;  %v1099_v20 = vmul.f32 %v2738_v41, %v862_v29 }
 0x1da   :  { %v1770_v17 = vpop.f32.mrf.mxu1 }
 0x1db   :  { %v1098_v16 = vmul.f32 %v2738_v41, %v857_v14  ;;  %v1155_v53 = vmul.f32 %v2741_v23, %v1099_v20  ;;  %v872_v52 = vadd.f32 %v1770_v17, %v2735_v21 }
 0x1dc   :  { %v866_v15 = vpop.f32.mrf.mxu1 }
 0x1dd   :  { %v1154_v51 = vmul.f32 %v2723_v35, %v1098_v16  ;;  %v1177_v2 = vsel %vm717_vm1, %v1155_v53, 0.0  ;;  %v1101_v3 = vmul.f32 %v2738_v41, %v872_v52  ;;  %v867_v59 = vadd.f32 %v2735_v21, %v866_v15 }
 0x1de   :  { %v1178_v28 = vrot.slane %v1177_v2, 4  ;;  %v1773_v34 = vpop.f32.mrf.mxu1  ;;  %v2789_v52 = vadd.f32 %v2721_v39, %v2728_v46 }
 0x1df   :  { %v1170_v12 = vsel %vm717_vm1, %v1154_v51, 0.0  ;;  %v1100_v8 = vmul.f32 %v2738_v41, %v867_v59  ;;  %v1157_v48 = vmul.f32 %v2743_v63, %v1101_v3  ;;  %v882_v9 = vadd.f32 %v1773_v34, %v2735_v21  ;;  %v2791_v51 = vpop.permute.xlu0 %1146 }
 0x1e0   :  { %v1171_v6 = vrot.slane %v1170_v12, 4  ;;  %v1179_v50 = vadd.f32 %v1178_v28, %v1177_v2  ;;  %v876_v22 = vpop.f32.mrf.mxu1 }
 0x1e1   :  { %v1156_v60 = vmul.f32 %v2730_v32, %v1100_v8  ;;  %v1191_v62 = vsel %vm717_vm1, %v1157_v48, 0.0  ;;  %v1103_v1 = vmul.f32 %v2738_v41, %v882_v9  ;;  %v877_v31 = vadd.f32 %v2735_v21, %v876_v22 }
 0x1e2   :  { %v1172_v5 = vadd.f32 %v1171_v6, %v1170_v12  ;;  %v1180_v40 = vrot.slane %v1179_v50, 2  ;;  %v1192_v45 = vrot.slane %v1191_v62, 4  ;;  %v1776_v24 = vpop.f32.mrf.mxu1 }
 0x1e3   :  { %v1184_v38 = vsel %vm717_vm1, %v1156_v60, 0.0  ;;  %v1102_v10 = vmul.f32 %v2738_v41, %v877_v31  ;;  %v1159_v54 = vmul.f32 %v2754_v13, %v1103_v1  ;;  %v892_v47 = vadd.f32 %v1776_v24, %v2735_v21 }
 0x1e4   :  { %v886_v44 = vpop.f32.mrf.mxu1  ;;  %v1185_v43 = vrot.slane %v1184_v38, 4  ;;  %v1173_v49 = vrot.slane %v1172_v5, 2  ;;  %v1181_v33 = vadd.f32 %v1180_v40, %v1179_v50  ;;  %v1193_v61 = vadd.f32 %v1192_v45, %v1191_v62 }
 0x1e5   :  { %v1158_v36 = vmul.f32 %v2764_v26, %v1102_v10  ;;  %v1105_v56 = vmul.f32 %v2738_v41, %v892_v47  ;;  %v1205_v30 = vsel %vm717_vm1, %v1159_v54, 0.0  ;;  %v887_v37 = vadd.f32 %v2735_v21, %v886_v44 }
 0x1e6   :  { %v1779_v27 = vpop.f32.mrf.mxu1  ;;  %v1186_v19 = vadd.f32 %v1185_v43, %v1184_v38  ;;  %v1206_v55 = vrot.slane %v1205_v30, 4  ;;  %v1174_v29 = vadd.f32 %v1173_v49, %v1172_v5  ;;  %v1182_v20 = vrot.slane %v1181_v33, 1 }
 0x1e7   :  { %v1198_v18 = vsel %vm717_vm1, %v1158_v36, 0.0  ;;  %v1161_v4 = vmul.f32 %v2770_v7, %v1105_v56  ;;  %v902_v25 = vadd.f32 %v1779_v27, %v2735_v21  ;;  %v1194_v17 = vrot.slane %v1193_v61, 2 }
 0x1e8   :  { %v896_v58 = vpop.f32.mrf.mxu1  ;;  %v1199_v57 = vrot.slane %v1198_v18, 4  ;;  %v1104_v2 = vmul.f32 %v2738_v41, %v887_v37  ;;  %v1187_v59 = vrot.slane %v1186_v19, 2  ;;  %v1207_v28 = vadd.f32 %v1206_v55, %v1205_v30 }
 0x1e9   :  { %v1219_v0 = vsel %vm717_vm1, %v1161_v4, 0.0  ;;  %v984_v11 = vcombine.high %v902_v25, %v902_v25  ;;  %v1286_v16 = vmul.f32 %v2782_v42, %v902_v25  ;;  %v1175_v8 = vrot.slane %v1174_v29, 1 }
 0x1ea   :  { %v1782_v14 = vpop.f32.mrf.mxu1  ;;  %v1220_v15 = vrot.slane %v1219_v0, 4  ;;  %v1200_v48 = vadd.f32 %v1199_v57, %v1198_v18  ;;  %v2796_v22 = vadd.f32 %v1182_v20, %v1181_v33  ;;  %v1195_v39 = vadd.f32 %v1194_v17, %v1193_v61 }
 0x1eb   :  { %v1287_v53 = vmul.f32 %v2782_v42, %v984_v11  ;;  %v1315_v34 = vsel %vm1300_vm11, %v1286_v16, 0.0  ;;  %v1160_v46 = vmul.f32 %v2791_v51, %v1104_v2  ;;  %v897_v60 = vadd.f32 %v2735_v21, %v896_v58 }
 0x1ec   :  { %v906_v3 = vpop.f32.mrf.mxu1  ;;  %v1316_v9 = vrot.slane %v1315_v34, 4  ;;  %v1221_v41 = vadd.f32 %v1220_v15, %v1219_v0  ;;  %v912_v31 = vadd.f32 %v1782_v14, %v2735_v21  ;;  %v1188_v5 = vadd.f32 %v1187_v59, %v1186_v19 }
 0x1ed   :  { %v1322_v12 = vsel %vm1300_vm11, %v1287_v53, 0.0  ;;  %v1208_v40 = vrot.slane %v1207_v28, 2  ;;  %v1212_v45 = vsel %vm717_vm1, %v1160_v46, 0.0  ;;  %v983_v24 = vcombine.high %v897_v60, %v897_v60 }
 0x1ee   :  { %v1323_v6 = vrot.slane %v1322_v12, 4  ;;  %v1785_v50 = vpop.f32.mrf.mxu1  ;;  %v1317_v62 = vadd.f32 %v1316_v9, %v1315_v34  ;;  %v1201_v10 = vrot.slane %v1200_v48, 2  ;;  %v1213_v44 = vrot.slane %v1212_v45, 4 }
 0x1ef   :  { %v1196_v43 = vrot.slane %v1195_v39, 1  ;;  %v1284_v36 = vmul.f32 %v2782_v42, %v897_v60  ;;  %v1285_v56 = vmul.f32 %v2782_v42, %v983_v24  ;;  %v986_v49 = vcombine.high %v912_v31, %v912_v31 }
 0x1f0   :  { %v1324_v1 = vadd.f32 %v1323_v6, %v1322_v12  ;;  %v2802_v38 = vpop.f32.mrf.mxu1  ;;  %v1318_v54 = vrot.slane %v1317_v62, 2  ;;  %v1222_v33 = vrot.slane %v1221_v41, 2  ;;  %v1214_v61 = vadd.f32 %v1213_v44, %v1212_v45 }
 0x1f1   :  { %v1301_v18 = vsel %vm1300_vm11, %v1284_v36, 0.0  ;;  %v1308_v4 = vsel %vm1300_vm11, %v1285_v56, 0.0  ;;  %v1290_v25 = vmul.f32 %v2782_v42, %v912_v31  ;;  %v1291_v37 = vmul.f32 %v2782_v42, %v986_v49 }
 0x1f2   :  { %v1325_v47 = vrot.slane %v1324_v1, 2  ;;  %v1319_v30 = vadd.f32 %v1318_v54, %v1317_v62  ;;  %v1788_v58 = vpop.f32.mrf.mxu1  ;;  %v1189_v19 = vrot.slane %v1188_v5, 1  ;;  %v1209_v55 = vadd.f32 %v1208_v40, %v1207_v28 }
 0x1f3   :  { %v1202_v0 = vadd.f32 %v1201_v10, %v1200_v48  ;;  %v1302_v11 = vrot.slane %v1301_v18, 4  ;;  %v1215_v57 = vrot.slane %v1214_v61, 2  ;;  %v1309_v14 = vrot.slane %v1308_v4, 4 }
 0x1f4   :  { %v1326_v27 = vadd.f32 %v1325_v47, %v1324_v1  ;;  %v1343_v20 = vsel %vm1300_vm11, %v1290_v25, 0.0  ;;  %v907_v17 = vadd.f32 %v2735_v21, %v906_v3  ;;  %v2812_v16 = vadd.f32 %v1175_v8, %v1174_v29  ;;  %v926_v6 = vpop.f32.mrf.mxu1 }
 0x1f5   :  { %v1223_v53 = vadd.f32 %v1222_v33, %v1221_v41  ;;  %v1303_v15 = vadd.f32 %v1302_v11, %v1301_v18  ;;  %v1350_v2 = vsel %vm1300_vm11, %v1291_v37, 0.0  ;;  %v1320_v59 = vrot.slane %v1319_v30, 1 }
 0x1f6   :  { %v1327_v34 = vrot.slane %v1326_v27, 1  ;;  %v1310_v12 = vadd.f32 %v1309_v14, %v1308_v4  ;;  %v985_v9 = vcombine.high %v907_v17, %v907_v17  ;;  %v1190_v28 = vadd.f32 %v1189_v19, %v1188_v5  ;;  %v1791_v5 = vpop.f32.mrf.mxu1 }
 0x1f7   :  { %v1197_v48 = vadd.f32 %v1196_v43, %v1195_v39  ;;  %v1210_v46 = vrot.slane %v1209_v55, 1  ;;  %v1344_v60 = vrot.slane %v1343_v20, 4  ;;  %v1203_v62 = vrot.slane %v1202_v0, 1 }
 0x1f8   :  { %v1216_v1 = vadd.f32 %v1215_v57, %v1214_v61  ;;  %v1351_v31 = vrot.slane %v1350_v2, 4  ;;  %v1288_v3 = vmul.f32 %v2782_v42, %v907_v17  ;;  %v1224_v29 = vrot.slane %v1223_v53, 1  ;;  %v936_v37 = vpop.f32.mrf.mxu1 }
 0x1f9   :  { %v1304_v8 = vrot.slane %v1303_v15, 2  ;;  %v1289_v41 = vmul.f32 %v2782_v42, %v985_v9  ;;  %v922_v40 = vadd.f32 %v1785_v50, %v2735_v21  ;;  %v1321_v45 = vadd.f32 %v1320_v59, %v1319_v30 }
 0x1fa   :  { %v1328_v24 = vadd.f32 %v1327_v34, %v1326_v27  ;;  %v1311_v10 = vrot.slane %v1310_v12, 2  ;;  %v1329_v54 = vsel %vm1300_vm11, %v1288_v3, 0.0  ;;  %v1345_v39 = vadd.f32 %v1344_v60, %v1343_v20  ;;  %v1794_v9 = vpop.f32.mrf.mxu1 }
 0x1fb   :  { %v1330_v47 = vrot.slane %v1329_v54, 4  ;;  %v1336_v44 = vsel %vm1300_vm11, %v1289_v41, 0.0  ;;  %v1107_v43 = vmul.f32 %v2789_v52, %v922_v40  ;;  %v2821_v36 = vadd.f32 %v1210_v46, %v1209_v55 }
 0x1fc   :  { %v1217_v56 = vrot.slane %v1216_v1, 1  ;;  %v1352_v49 = vadd.f32 %v1351_v31, %v1350_v2  ;;  %v1337_v33 = vrot.slane %v1336_v44, 4  ;;  %v2823_v42 = vadd.f32 %v1203_v62, %v1202_v0 }
 0x1fd   :  { %v1305_v50 = vadd.f32 %v1304_v8, %v1303_v15  ;;  %v1163_v30 = vmul.f32 %v2741_v23, %v1107_v43  ;;  %v917_v27 = vadd.f32 %v2735_v21, %v2802_v38  ;;  %v2828_v61 = vadd.f32 %v1224_v29, %v1223_v53 }
 0x1fe   :  { %v2830_v18 = vadd.f32 %v1321_v45, %v1190_v28  ;;  %v1312_v4 = vadd.f32 %v1311_v10, %v1310_v12  ;;  %v1331_v25 = vadd.f32 %v1330_v47, %v1329_v54  ;;  %v2832_v19 = vadd.f32 %v1328_v24, %v1197_v48  ;;  %v946_v24 = vpop.f32.mrf.mxu1 }
 0x1ff   :  { %v1346_v55 = vrot.slane %v1345_v39, 2  ;;  %v1233_v11 = vsel %vm717_vm1, %v1163_v30, 0.0  ;;  %v1106_v0 = vmul.f32 %v2789_v52, %v917_v27  ;;  %v2836_v57 = vadd.f32 %v1217_v56, %v1216_v1 }
 0x200   :  { %v1353_v23 = vrot.slane %v1352_v49, 2  ;;  %v1338_v14 = vadd.f32 %v1337_v33, %v1336_v44  ;;  %v1234_v20 = vrot.slane %v1233_v11, 4  ;;  %v1306_v38 = vrot.slane %v1305_v50, 1 }
 0x201   :  { %v1162_v17 = vmul.f32 %v2723_v35, %v1106_v0  ;;  %v932_v53 = vadd.f32 %v1788_v58, %v2735_v21  ;;  %v927_v15 = vadd.f32 %v2735_v21, %v926_v6  ;;  %v1313_v2 = vrot.slane %v1312_v4, 1 }
 0x202   :  { %v1332_v59 = vrot.slane %v1331_v25, 2  ;;  %v1235_v34 = vadd.f32 %v1234_v20, %v1233_v11  ;;  %v942_v12 = vadd.f32 %v1791_v5, %v2735_v21  ;;  %v1347_v28 = vadd.f32 %v1346_v55, %v1345_v39 }
 0x203   :  { %v1226_v48 = vsel %vm717_vm1, %v1162_v17, 0.0  ;;  %v1109_v46 = vmul.f32 %v2789_v52, %v932_v53  ;;  %v1108_v60 = vmul.f32 %v2789_v52, %v927_v15  ;;  %v2845_v62 = vadd.f32 %v1353_v23, %v1352_v49 }
 0x204   :  { %v1339_v35 = vrot.slane %v1338_v14, 2  ;;  %v1227_v1 = vrot.slane %v1226_v48, 4  ;;  %v1111_v58 = vmul.f32 %v2789_v52, %v942_v12  ;;  %v1307_v6 = vadd.f32 %v1306_v38, %v1305_v50 }
 0x205   :  { %v1165_v31 = vmul.f32 %v2743_v63, %v1109_v46  ;;  %v1164_v3 = vmul.f32 %v2730_v32, %v1108_v60  ;;  %v937_v29 = vadd.f32 %v2735_v21, %v936_v37  ;;  %v1333_v8 = vadd.f32 %v1332_v59, %v1331_v25 }
 0x206   :  { %v1236_v41 = vrot.slane %v1235_v34, 2  ;;  %v1228_v40 = vadd.f32 %v1227_v1, %v1226_v48  ;;  %v1167_v45 = vmul.f32 %v2754_v13, %v1111_v58  ;;  %v1314_v10 = vadd.f32 %v1313_v2, %v1312_v4  ;;  %v1797_v4 = vpop.f32.mrf.mxu1 }
 0x207   :  { %v1247_v54 = vsel %vm717_vm1, %v1165_v31, 0.0  ;;  %v1240_v5 = vsel %vm717_vm1, %v1164_v3, 0.0  ;;  %v1110_v39 = vmul.f32 %v2789_v52, %v937_v29  ;;  %v1340_v47 = vadd.f32 %v1339_v35, %v1338_v14 }
 0x208   :  { %v1229_v44 = vrot.slane %v1228_v40, 2  ;;  %v1248_v63 = vrot.slane %v1247_v54, 4  ;;  %v1241_v43 = vrot.slane %v1240_v5, 4  ;;  %v1261_v32 = vsel %vm717_vm1, %v1167_v45, 0.0 }
 0x209   :  { %v1166_v56 = vmul.f32 %v2764_v26, %v1110_v39  ;;  %v952_v49 = vadd.f32 %v1794_v9, %v2735_v21  ;;  %v947_v13 = vadd.f32 %v2735_v21, %v946_v24  ;;  %v1334_v33 = vrot.slane %v1333_v8, 1 }
 0x20a   :  { %v1237_v50 = vadd.f32 %v1236_v41, %v1235_v34  ;;  %v1249_v30 = vadd.f32 %v1248_v63, %v1247_v54  ;;  %v1242_v27 = vadd.f32 %v1241_v43, %v1240_v5  ;;  %v1262_v25 = vrot.slane %v1261_v32, 4 }
 0x20b   :  { %v1254_v37 = vsel %vm717_vm1, %v1166_v56, 0.0  ;;  %v1113_v55 = vmul.f32 %v2789_v52, %v952_v49  ;;  %v1112_v11 = vmul.f32 %v2789_v52, %v947_v13  ;;  %v1414_v0 = vadd.f32 %v1314_v10, %v2796_v22  ;;  %v2870_v52 = vld [vmem:[%s2960_s2 + $0x4] sm:$0xf]  ;;  %v956_v22 = vpop.f32.mrf.mxu1 }
 0x20c   :  { %v1348_v23 = vrot.slane %v1347_v28, 1  ;;  %v1341_v26 = vrot.slane %v1340_v47, 1  ;;  %v1250_v14 = vrot.slane %v1249_v30, 2  ;;  %v1413_v20 = vadd.f32 %v1307_v6, %v2812_v16 }
 0x20d   :  { %v1230_v38 = vadd.f32 %v1229_v44, %v1228_v40  ;;  %v1169_v17 = vmul.f32 %v2770_v7, %v1113_v55  ;;  %v962_v53 = vadd.f32 %v1797_v4, %v2735_v21  ;;  %v1335_v15 = vadd.f32 %v1334_v33, %v1333_v8  ;;  %v1800_v41 = vpop.f32.mrf.mxu1 }
 0x20e   :  { %v1243_v2 = vrot.slane %v1242_v27, 2  ;;  %v1255_v59 = vrot.slane %v1254_v37, 4  ;;  %v1168_v34 = vmul.f32 %v2791_v51, %v1112_v11  ;;  %v1355_v12 = vrot.slane %v2845_v62, 1 }
 0x20f   :  { %v1238_v9 = vrot.slane %v1237_v50, 1  ;;  %v1263_v16 = vadd.f32 %v1262_v25, %v1261_v32  ;;  %v988_v48 = vcombine.high %v962_v53, %v962_v53  ;;  %v2874_v7 = vsel %vm1453_vm12, %v1414_v0, %v1413_v20 }
 0x210   :  { %v2876_v46 = vadd.f32 %v1348_v23, %v1347_v28  ;;  %v2878_v60 = vadd.f32 %v1341_v26, %v1340_v47  ;;  %v1251_v35 = vadd.f32 %v1250_v14, %v1249_v30  ;;  %v1231_v51 = vrot.slane %v1230_v38, 1 }
 0x211   :  { %v1275_v1 = vsel %vm717_vm1, %v1169_v17, 0.0  ;;  %v1294_v58 = vmul.f32 %v2870_v52, %v962_v53  ;;  %v1295_v6 = vmul.f32 %v2870_v52, %v988_v48  ;;  %v2884_v31 = vadd.f32 %v1335_v15, %v2823_v42  ;;  %v966_v17 = vpop.f32.mrf.mxu1 }
 0x212   :  { %v1244_v3 = vadd.f32 %v1243_v2, %v1242_v27  ;;  %v1256_v29 = vadd.f32 %v1255_v59, %v1254_v37  ;;  %v1268_v8 = vsel %vm717_vm1, %v1168_v34, 0.0  ;;  %v2887_v28 = vadd.f32 %v1238_v9, %v1237_v50 }
 0x213   :  { %v1264_v40 = vrot.slane %v1263_v16, 2  ;;  %v1371_v45 = vsel %vm1300_vm11, %v1294_v58, 0.0  ;;  %v1378_v24 = vsel %vm1300_vm11, %v1295_v6, 0.0  ;;  %v1252_v10 = vrot.slane %v1251_v35, 1 }
 0x214   :  { %v1276_v54 = vrot.slane %v1275_v1, 4  ;;  %v1372_v5 = vrot.slane %v1371_v45, 4  ;;  %v1379_v39 = vrot.slane %v1378_v24, 4  ;;  %v2891_v47 = vadd.f32 %v1231_v51, %v1230_v38 }
 0x215   :  { %v1269_v42 = vrot.slane %v1268_v8, 4  ;;  %v957_v44 = vadd.f32 %v2735_v21, %v956_v22  ;;  %v972_v63 = vadd.f32 %v1800_v41, %v2735_v21  ;;  %v1245_v43 = vrot.slane %v1244_v3, 1 }
 0x216   :  { %v1257_v32 = vrot.slane %v1256_v29, 2  ;;  %v1373_v56 = vadd.f32 %v1372_v5, %v1371_v45  ;;  %v1380_v49 = vadd.f32 %v1379_v39, %v1378_v24  ;;  %v2895_v13 = vadd.f32 %v1264_v40, %v1263_v16 }
 0x217   :  { %v987_v33 = vcombine.high %v957_v44, %v957_v44  ;;  %v1292_v50 = vmul.f32 %v2870_v52, %v957_v44  ;;  %v990_v30 = vcombine.high %v972_v63, %v972_v63  ;;  %v2898_v27 = vadd.f32 %v1252_v10, %v1251_v35 }
 0x218   :  { %v1277_v4 = vadd.f32 %v1276_v54, %v1275_v1  ;;  %v1374_v25 = vrot.slane %v1373_v56, 2  ;;  %v1298_v37 = vmul.f32 %v2870_v52, %v972_v63  ;;  %v1270_v55 = vadd.f32 %v1269_v42, %v1268_v8 }
 0x219   :  { %v1293_v11 = vmul.f32 %v2870_v52, %v987_v33  ;;  %v1357_v0 = vsel %vm1300_vm11, %v1292_v50, 0.0  ;;  %v1299_v23 = vmul.f32 %v2870_v52, %v990_v30  ;;  %v1246_v26 = vadd.f32 %v1245_v43, %v1244_v3 }
 0x21a   :  { %v1375_v14 = vadd.f32 %v1374_v25, %v1373_v56  ;;  %v1381_v20 = vrot.slane %v1380_v49, 2  ;;  %v1358_v38 = vrot.slane %v1357_v0, 4  ;;  %v2904_v53 = vadd.f32 %v1257_v32, %v1256_v29 }
 0x21b   :  { %v1364_v15 = vsel %vm1300_vm11, %v1293_v11, 0.0  ;;  %v1399_v2 = vsel %vm1300_vm11, %v1298_v37, 0.0  ;;  %v1406_v59 = vsel %vm1300_vm11, %v1299_v23, 0.0  ;;  %v1266_v34 = vrot.slane %v2895_v13, 1 }
 0x21c   :  { %v1278_v22 = vrot.slane %v1277_v4, 2  ;;  %v1359_v9 = vadd.f32 %v1358_v38, %v1357_v0  ;;  %v1365_v16 = vrot.slane %v1364_v15, 4  ;;  %v1271_v48 = vrot.slane %v1270_v55, 2 }
 0x21d   :  { %v1400_v35 = vrot.slane %v1399_v2, 4  ;;  %v1407_v51 = vrot.slane %v1406_v59, 4  ;;  %v967_v1 = vadd.f32 %v2735_v21, %v966_v17  ;;  %v1376_v58 = vrot.slane %v1375_v14, 1 }
 0x21e   :  { %v1382_v6 = vadd.f32 %v1381_v20, %v1380_v49  ;;  %v1360_v3 = vrot.slane %v1359_v9, 2  ;;  %v1366_v29 = vadd.f32 %v1365_v16, %v1364_v15  ;;  %v1259_v24 = vrot.slane %v2904_v53, 1 }
 0x21f   :  { %v1401_v8 = vadd.f32 %v1400_v35, %v1399_v2  ;;  %v1408_v41 = vadd.f32 %v1407_v51, %v1406_v59  ;;  %v989_v40 = vcombine.high %v967_v1, %v967_v1  ;;  %v1296_v45 = vmul.f32 %v2870_v52, %v967_v1 }
 0x220   :  { %v1279_v10 = vadd.f32 %v1278_v22, %v1277_v4  ;;  %v1361_v54 = vadd.f32 %v1360_v3, %v1359_v9  ;;  %v1367_v5 = vrot.slane %v1366_v29, 2  ;;  %v1383_v63 = vrot.slane %v1382_v6, 1 }
 0x221   :  { %v1402_v39 = vrot.slane %v1401_v8, 2  ;;  %v1409_v21 = vrot.slane %v1408_v41, 2  ;;  %v1297_v42 = vmul.f32 %v2870_v52, %v989_v40  ;;  %v1385_v44 = vsel %vm1300_vm11, %v1296_v45, 0.0 }
 0x222   :  { %v1362_v43 = vrot.slane %v1361_v54, 1  ;;  %v1368_v32 = vadd.f32 %v1367_v5, %v1366_v29  ;;  %v1386_v56 = vrot.slane %v1385_v44, 4  ;;  %v1272_v49 = vadd.f32 %v1271_v48, %v1270_v55 }
 0x223   :  { %v1377_v33 = vadd.f32 %v1376_v58, %v1375_v14  ;;  %v1392_v50 = vsel %vm1300_vm11, %v1297_v42, 0.0  ;;  %v1356_v30 = vadd.f32 %v1355_v12, %v2845_v62  ;;  %v1403_v0 = vadd.f32 %v1402_v39, %v1401_v8 }
 0x224   :  { %v1363_v4 = vadd.f32 %v1362_v43, %v1361_v54  ;;  %v1369_v25 = vrot.slane %v1368_v32, 1  ;;  %v1387_v37 = vadd.f32 %v1386_v56, %v1385_v44  ;;  %v1393_v11 = vrot.slane %v1392_v50, 4 }
 0x225   :  { %v1410_v52 = vadd.f32 %v1409_v21, %v1408_v41  ;;  %v1418_v23 = vadd.f32 %v2878_v60, %v2821_v36  ;;  %v1456_v55 = vsel %vm1455_vm13, %v2830_v18, %v2874_v7  ;;  %v1384_v14 = vadd.f32 %v1383_v63, %v1382_v6 }
 0x226   :  { %v1370_v20 = vadd.f32 %v1369_v25, %v1368_v32  ;;  %v1388_v38 = vrot.slane %v1387_v37, 2  ;;  %v1394_v17 = vadd.f32 %v1393_v11, %v1392_v50  ;;  %v1423_v15 = vadd.f32 %v1377_v33, %v1246_v26 }
 0x227   :  { %v1421_v62 = vadd.f32 %v1363_v4, %v2891_v47  ;;  %v1419_v12 = vadd.f32 %v2876_v46, %v2836_v57  ;;  %v1458_v2 = vsel %vm1457_vm14, %v2832_v19, %v1456_v55  ;;  %v1404_v7 = vrot.slane %v1403_v0, 1 }
 0x228   :  { %v1422_v59 = vadd.f32 %v1370_v20, %v2887_v28  ;;  %v1389_v36 = vadd.f32 %v1388_v38, %v1387_v37  ;;  %v1395_v60 = vrot.slane %v1394_v17, 2  ;;  %v1460_v18 = vsel %vm1459_vm15, %v2884_v31, %v1458_v2 }
 0x229   :  { %v1411_v22 = vrot.slane %v1410_v52, 1  ;;  %v1420_v9 = vadd.f32 %v1356_v30, %v2828_v61  ;;  %v1462_v26 = vsel %vm1461_vm0, %v1418_v23, %v1460_v18  ;;  %v1273_v19 = vrot.slane %v1272_v49, 1 }
 0x22a   :  { %v1467_v47 = vsel %vm1453_vm12, %v1422_v59, %v1421_v62  ;;  %v1390_v16 = vrot.slane %v1389_v36, 1  ;;  %v1396_v57 = vadd.f32 %v1395_v60, %v1394_v17  ;;  %v1464_v46 = vsel %vm1463_vm2, %v1419_v12, %v1462_v26 }
 0x22b   :  { %v1424_v28 = vadd.f32 %v1384_v14, %v2898_v27  ;;  %v1466_v48 = vsel %vm1465_vm3, %v1420_v9, %v1464_v46  ;;  %v1468_v35 = vsel %vm1455_vm13, %v1423_v15, %v1467_v47  ;;  %v1260_v31 = vadd.f32 %v1259_v24, %v2904_v53 }
 0x22c   :  { %v1280_v51 = vrot.slane %v1279_v10, 1  ;;  %v1391_v1 = vadd.f32 %v1390_v16, %v1389_v36  ;;  %v1397_v61 = vrot.slane %v1396_v57, 1  ;;  %1820 = vmatprep.mubr.msk.f32.mxu1 %vm717_vm1, %v1466_v48  ;;  %v1405_v58 = vadd.f32 %v1404_v7, %v1403_v0 }
 0x22d   :  { %v1469_v6 = vsel %vm1457_vm14, %v1424_v28, %v1468_v35  ;;  %v1267_v3 = vadd.f32 %v1266_v34, %v2895_v13  ;;  %v1412_v29 = vadd.f32 %v1411_v22, %v1410_v52  ;;  %v1274_v41 = vadd.f32 %v1273_v19, %v1272_v49  ;;  %v1648_v13 = vld [vmem:[%s2966_s8 + $0x3] ss:$0 sm:$0xff] }
 0x22e   :  { %v1398_v27 = vadd.f32 %v1397_v61, %v1396_v57  ;;  %v1425_v8 = vadd.f32 %v1391_v1, %v1260_v31  ;;  %v1281_v40 = vadd.f32 %v1280_v51, %v1279_v10 }
 0x22f   :  { %v1427_v24 = vadd.f32 %v1405_v58, %v1274_v41 }
 0x230   :  { %v1426_v45 = vadd.f32 %v1398_v27, %v1267_v3  ;;  %v1470_v53 = vsel %vm1459_vm15, %v1425_v8, %v1469_v6  ;;  %v1428_v54 = vadd.f32 %v1412_v29, %v1281_v40 }
 0x232   :  { %v1471_v5 = vsel %vm1461_vm0, %v1426_v45, %v1470_v53 }
 0x233   :  { %v1472_v39 = vsel %vm1463_vm2, %v1427_v24, %v1471_v5 }
 0x234   :  { %v1473_v21 = vsel %vm1465_vm3, %v1428_v54, %v1472_v39 }
 0x235   :  { %1821 = vmatmul.mubr.msk.f32.vlgmr.msra.gmra.mxu1 %vm717_vm1, %v1473_v21 }
 0x2f5   :  { %v1822_v34 = vpop.f32.mrf.mxu1 }
 0x2f6   :  { %v1550_v10 = vadd.f32 %v1822_v34, %v1648_v13 }
 0x2f7   :  { %v1544_v42 = vpop.f32.mrf.mxu1 }
 0x2f8   :  { %1554 = vst.msk [vmem:[#allocation2 + $0x8] sm:$0xff] %vm717_vm1, %v1550_v10  ;;  %v1545_v44 = vadd.f32 %v1648_v13, %v1544_v42 }
 0x2fa   :  { %1553 = vst.msk [vmem:[#allocation2] sm:$0xff] %vm717_vm1, %v1545_v44 }
 0x2fb   :  { %1936 = shalt.err (!%p1933_p4)
}
 0x2fc   :  { %s1949_s20 = smov 128   ;;  %s1950_s8 = smov 8  }
 0x2fd   :  { %1566 = dma.vmem_to_hbm [thread:$0]  %s1561_s4, 256, %s2967_s9, [#allocation3], %s1949_s20, %s1949_s20, %s1950_s8  }
 0x2fe   :  { %1945 = dma.done.wait [#allocation3], 256  }
 0x2ff   :  { %1946 = vsyncadd [#allocation3], 4294967040 }
 0x300   :  { %1570 = vsyncpa [#allocation3], 1 }

</bundles_post_ra>
